<compile_context>
chip_gen: v7x
topology: tpu7x:2x2x1
jax: 0.10.0
libtpu: 0.0.40
codegen_flags: <defaults>
</compile_context>

<pallas_src>
import functools

import jax
import jax.numpy as jnp
from jax.experimental import pallas as pl
from jax.experimental.pallas import tpu as pltpu

_TILE = 512                      # preferred M / K tile for the aggregation matmul
_NODE_PAD = 256                  # node-dim padding granularity (divides every tile)
_LANE = 128                      # feature dims padded to a multiple of this
_VMEM_LIMIT = 32 * 1024 * 1024   # explicit scoped-VMEM limit (safe on v5e..v7x)
_XW_RESIDENT_BYTES = 8 * 1024 * 1024   # keep XW resident if it fits this budget
_NEG_FILL = -1e30                # masks padded classes inside log_softmax


def _round_up(x, m):
    return ((x + m - 1) // m) * m


def _pick_tile(n_pad, pref=_TILE):
    """Largest tile <= pref that divides n_pad (n_pad is a multiple of _NODE_PAD)."""
    t = min(pref, n_pad)
    while n_pad % t:
        t -= _NODE_PAD
    return t


def _pick_row_tile(n_pad, pref=_TILE):
    """Like _pick_tile, but keep >= 2 row tiles when possible (v7x megacore split)."""
    tm = _pick_tile(n_pad, pref)
    if n_pad // tm < 2 and n_pad >= 2 * _NODE_PAD:
        tm = n_pad // 2
    return tm


# ---------------------------------------------------------------------------
# Pallas kernels
# ---------------------------------------------------------------------------
def _xw_kernel(x_ref, w_ref, o_ref):
    # One row-tile of XW = X @ W (computed once per layer, not per A-tile).
    o_ref[...] = jnp.dot(x_ref[...], w_ref[...],
                         preferred_element_type=jnp.float32).astype(o_ref.dtype)


def _agg_compute(a_ref, xw_ref, b_ref, o_ref, acc, *, final, tk, xw_resident):
    # acc[i, :] += A_hat[i_tile, k_tile] @ XW[k_tile, :]; epilogue on last k.
    k = pl.program_id(1)

    @pl.when(k == 0)
    def _():
        acc[...] = jnp.zeros_like(acc)

    if xw_resident:
        # Full XW is resident in VMEM; slice the current K slab.
        start = pl.multiple_of(k * tk, tk)
        xw = xw_ref[pl.ds(start, tk), :]
    else:
        xw = xw_ref[...]

    acc[...] += jnp.dot(a_ref[...], xw, preferred_element_type=jnp.float32)

    @pl.when(k == pl.num_programs(1) - 1)
    def _():
        z = acc[...] + b_ref[...]            # f32 epilogue (v5e has no bf16 VPU)
        if final:
            m = jnp.max(z, axis=-1, keepdims=True)
            s = z - m
            lse = jnp.log(jnp.sum(jnp.exp(s), axis=-1, keepdims=True))
            o_ref[...] = (s - lse).astype(o_ref.dtype)
        else:
            o_ref[...] = jnp.maximum(z, 0.0).astype(o_ref.dtype)


def _agg_scratch_kernel(a_ref, xw_ref, b_ref, o_ref, acc_ref, **kw):
    # bf16 output: accumulate in an f32 VMEM scratch, cast in the epilogue.
    _agg_compute(a_ref, xw_ref, b_ref, o_ref, acc_ref, **kw)


def _agg_inplace_kernel(a_ref, xw_ref, b_ref, o_ref, **kw):
    # f32 output: the output block is resident across k -> accumulate in place.
    _agg_compute(a_ref, xw_ref, b_ref, o_ref, o_ref, **kw)


# ---------------------------------------------------------------------------
# pallas_call wrappers
# ---------------------------------------------------------------------------
def _xw_pallas(x, w, out_dtype):
    """XW = X @ W, row-tiled.  x: (n_pad, f_in_pad), w: (f_in_pad, f_out_pad)."""
    n_pad, f_in = x.shape
    f_out = w.shape[1]
    tm = _pick_row_tile(n_pad)
    grid = (n_pad // tm,)
    bytes_accessed = (x.size * x.dtype.itemsize + w.size * w.dtype.itemsize
                      + n_pad * f_out * jnp.dtype(out_dtype).itemsize)
    return pl.pallas_call(
        _xw_kernel,
        out_shape=jax.ShapeDtypeStruct((n_pad, f_out), out_dtype),
        grid_spec=pltpu.PrefetchScalarGridSpec(
            num_scalar_prefetch=0,
            grid=grid,
            in_specs=[pl.BlockSpec((tm, f_in), lambda i: (i, 0)),
                      pl.BlockSpec((f_in, f_out), lambda i: (0, 0))],
            out_specs=pl.BlockSpec((tm, f_out), lambda i: (i, 0)),
        ),
        compiler_params=pltpu.CompilerParams(
            dimension_semantics=("parallel",),
            vmem_limit_bytes=_VMEM_LIMIT),
        cost_estimate=pl.CostEstimate(
            flops=2 * n_pad * f_in * f_out,
            transcendentals=0,
            bytes_accessed=bytes_accessed),
    )(x, w)


def _agg_pallas(a_pad, xw, b_pad, *, final, out_dtype, xw_resident_bytes):
    """Z = A_hat @ XW + b, then ReLU or log_softmax.  Tiled (M, K) grid."""
    n_pad = a_pad.shape[0]
    f_out = xw.shape[1]
    tm = _pick_row_tile(n_pad)
    tk = _pick_tile(n_pad)
    grid = (n_pad // tm, n_pad // tk)

    xw_bytes = xw.size * xw.dtype.itemsize
    xw_resident = xw_bytes <= xw_resident_bytes
    in_place = jnp.dtype(out_dtype) == jnp.dtype(jnp.float32)

    if xw_resident:
        # Whole XW slab stays in VMEM across the grid (fetched once).
        xw_spec = pl.BlockSpec((n_pad, f_out), lambda i, k: (0, 0))
        xw_stream_bytes = xw_bytes
    else:
        # Streamed per K tile; it is re-fetched once per row tile.
        xw_spec = pl.BlockSpec((tk, f_out), lambda i, k: (k, 0))
        xw_stream_bytes = (n_pad // tm) * xw_bytes

    out_bytes = n_pad * f_out * jnp.dtype(out_dtype).itemsize
    bytes_accessed = (a_pad.size * a_pad.dtype.itemsize
                      + xw_stream_bytes
                      + b_pad.size * b_pad.dtype.itemsize
                      + out_bytes)

    common = dict(final=final, tk=tk, xw_resident=xw_resident)
    if in_place:
        kernel = functools.partial(_agg_inplace_kernel, **common)
        scratch_shapes = []
    else:
        kernel = functools.partial(_agg_scratch_kernel, **common)
        scratch_shapes = [pltpu.VMEM((tm, f_out), jnp.float32)]

    return pl.pallas_call(
        kernel,
        out_shape=jax.ShapeDtypeStruct((n_pad, f_out), out_dtype),
        grid_spec=pltpu.PrefetchScalarGridSpec(
            num_scalar_prefetch=0,
            grid=grid,
            in_specs=[
                pl.BlockSpec((tm, tk), lambda i, k: (i, k)),   # A_hat tile
                xw_spec,                                       # XW (resident or slab)
                pl.BlockSpec((1, f_out), lambda i, k: (0, 0)), # bias
            ],
            out_specs=pl.BlockSpec((tm, f_out), lambda i, k: (i, 0)),
            scratch_shapes=scratch_shapes,
        ),
        compiler_params=pltpu.CompilerParams(
            dimension_semantics=("parallel", "arbitrary"),
            vmem_limit_bytes=_VMEM_LIMIT),
        cost_estimate=pl.CostEstimate(
            flops=2 * n_pad * n_pad * f_out,
            transcendentals=(n_pad * f_out) if final else 0,
            bytes_accessed=int(bytes_accessed)),
    )(a_pad, xw, b_pad)


# ---------------------------------------------------------------------------
# Plain-JAX glue: PyG-style gcn_norm -> dense normalized adjacency (padded)
# ---------------------------------------------------------------------------
def build_normalized_adjacency_padded(edge_index, num_nodes, n_pad,
                                      edge_weight=None, out_dtype=jnp.float32):
    """A_hat[t, s] = deg^{-1/2}[s] * w * deg^{-1/2}[t], add_remaining_self_loops.

    Scatters directly into the (n_pad, n_pad) buffer and casts once.
    """
    row, col = edge_index[0], edge_index[1]            # source, target
    if edge_weight is None:
        edge_weight = jnp.ones(row.shape[0], dtype=jnp.float32)
    edge_weight = edge_weight.astype(jnp.float32)

    # add_remaining_self_loops: drop existing self-loops, add exactly one
    # self-loop per node; its weight is the existing self-loop weight if
    # present, else 1.  (Duplicate self-loop edges: an arbitrary one survives.)
    is_loop = row == col
    w_edges = jnp.where(is_loop, 0.0, edge_weight)
    loop_idx = jnp.where(is_loop, row, num_nodes)      # OOB for non-loop edges
    loop_w = jnp.ones(num_nodes, dtype=jnp.float32)
    loop_w = loop_w.at[loop_idx].set(jnp.where(is_loop, edge_weight, 1.0),
                                     mode="drop")

    deg = jnp.zeros(num_nodes, dtype=jnp.float32).at[col].add(w_edges) + loop_w
    dis = jnp.where(deg > 0, jax.lax.rsqrt(deg), 0.0)
    norm = dis[row] * w_edges * dis[col]

    a_pad = jnp.zeros((n_pad, n_pad), dtype=jnp.float32)
    a_pad = a_pad.at[col, row].add(norm)               # aggregate at target
    idx = jnp.arange(num_nodes)
    a_pad = a_pad.at[idx, idx].add(dis * dis * loop_w) # self-loop contribution
    return a_pad.astype(out_dtype)
    # TODO(synk): dense A_hat is O(N^2) memory; a sparse/blocked gather path is
    # needed for very large graphs.


# ---------------------------------------------------------------------------
# Model: parameters + forward
# ---------------------------------------------------------------------------
def init_params(key, in_c, h_c, out_c, n_layers):
    params = []
    dims = [in_c] + [h_c] * (n_layers - 1) + [out_c]
    for i in range(n_layers):
        key, wk = jax.random.split(key)
        fan_in, fan_out = dims[i], dims[i + 1]
        limit = jnp.sqrt(6.0 / (fan_in + fan_out))     # glorot uniform
        w = jax.random.uniform(wk, (fan_in, fan_out), jnp.float32, -limit, limit)
        b = jnp.zeros((1, fan_out), dtype=jnp.float32)
        params.append((w, b))
    return params


@functools.partial(jax.jit,
                   static_argnames=("num_nodes", "compute_dtype",
                                    "xw_resident_bytes"))
def gcn_forward(params, x, edge_index, num_nodes, edge_weight=None, *,
                compute_dtype=jnp.bfloat16,
                xw_resident_bytes=_XW_RESIDENT_BYTES):
    n = num_nodes
    out_c = params[-1][0].shape[1]
    n_layers = len(params)

    # Pad node dim to the tile granularity; build A_hat straight into the padded
    # buffer in the MXU compute dtype (single scatter + single cast).
    n_pad = _round_up(n, _NODE_PAD)
    a_pad = build_normalized_adjacency_padded(edge_index, n, n_pad,
                                              edge_weight, compute_dtype)

    # Pad feature dims to lane multiples; cast activations in the same pass.
    f_in_pad = _round_up(x.shape[1], _LANE)
    h = jnp.zeros((n_pad, f_in_pad), compute_dtype)
    h = h.at[:n, :x.shape[1]].set(x.astype(compute_dtype))

    for i, (w, b) in enumerate(params):
        final = (i == n_layers - 1)
        f_in, f_out = w.shape
        f_out_pad = _round_up(f_out, _LANE)

        # Zero-pad W (rows to the incoming padded width, cols to lane multiple).
        w_pad = jnp.zeros((h.shape[1], f_out_pad), compute_dtype)
        w_pad = w_pad.at[:f_in, :f_out].set(w.astype(compute_dtype))

        # Bias: padded lanes are 0 for hidden layers (ReLU keeps them 0) and
        # -1e30 for the final layer so log_softmax ignores the padded classes.
        # (Safe because the final epilogue / output stay f32.)
        fill = _NEG_FILL if final else 0.0
        b_pad = jnp.full((1, f_out_pad), fill, jnp.float32).at[:, :f_out].set(b)

        xw = _xw_pallas(h, w_pad, compute_dtype)               # (n_pad, f_out_pad)
        h = _agg_pallas(a_pad, xw, b_pad, final=final,
                        out_dtype=jnp.float32 if final else compute_dtype,
                        xw_resident_bytes=xw_resident_bytes)
        # dropout: identity in eval mode (training=False)

    return h[:n, :out_c]


# pure-JAX reference for a sanity check
def gcn_forward_ref(params, x, edge_index, num_nodes, edge_weight=None):
    a_hat = build_normalized_adjacency_padded(edge_index, num_nodes, num_nodes,
                                              edge_weight, jnp.float32)
    h = x
    for i in range(len(params) - 1):
        w, b = params[i]
        h = jnp.maximum(a_hat @ (h @ w) + b, 0.0)
    w, b = params[-1]
    z = a_hat @ (h @ w) + b
    return jax.nn.log_softmax(z, axis=-1)


if __name__ == "__main__":
    key = jax.random.PRNGKey(0)
    N, E = 16, 40            # nodes, edges
    in_c, h_c, out_c = 8, 32, 4
    n_layers = 2

    k_x, k_e, k_p = jax.random.split(key, 3)
    x = jax.random.normal(k_x, (N, in_c), dtype=jnp.float32)
    edge_index = jax.random.randint(k_e, (2, E), 0, N, dtype=jnp.int32)
    params = init_params(k_p, in_c, h_c, out_c, n_layers)

    ref = gcn_forward_ref(params, x, edge_index, N)

    # f32 compute path (in-place accumulation, resident XW): tight check.
    out_f32 = jax.block_until_ready(
        gcn_forward(params, x, edge_index, N, compute_dtype=jnp.float32))
    assert out_f32.shape == (N, out_c)
    assert jnp.allclose(out_f32, ref, atol=1e-4, rtol=1e-4), "f32 mismatch vs reference"

    # bf16 compute path (default / performance, resident XW): looser tolerance.
    out = jax.block_until_ready(gcn_forward(params, x, edge_index, N))
    assert out.shape == (N, out_c)
    assert out.dtype == jnp.float32
    assert jnp.allclose(out, ref, atol=1e-1, rtol=1e-1), "bf16 mismatch vs reference"

    # bf16 path with XW streaming forced (exercises the large-graph fallback).
    out_stream = jax.block_until_ready(
        gcn_forward(params, x, edge_index, N, xw_resident_bytes=0))
    assert jnp.allclose(out_stream, ref, atol=1e-1, rtol=1e-1), \
        "streamed-XW mismatch vs reference"

    print("KERNEL_OK")
</pallas_src>

<mosaic_0001>
module attributes {stable_mosaic.version = 11 : i64} {
  func.func private @main(%arg0: i32) attributes {dimension_semantics = [#tpu.dimension_semantics<core_parallel>], iteration_bounds = array<i64: 2>, tpu.core_type = #tpu.core_type<sc_scalar_subcore>, window_params = []} {
    return
  }
}

module attributes {stable_mosaic.version = 11 : i64} {
  func.func private @main(%arg0: i32) attributes {dimension_semantics = [#tpu.dimension_semantics<core_parallel>], iteration_bounds = array<i64: 2>, tpu.core_type = #tpu.core_type<sc_scalar_subcore>, window_params = []} {
    return
  }
}

module attributes {stable_mosaic.version = 11 : i64} {
  func.func @_xw_kernel(%arg0: i32, %arg1: memref<256x128xf32, #tpu.memory_space<vmem>>, %arg2: memref<128x128xf32, #tpu.memory_space<vmem>>, %arg3: memref<256x128xf32, #tpu.memory_space<vmem>>) attributes {dimension_semantics = [#tpu.dimension_semantics<parallel>], iteration_bounds = array<i64: 1>, scalar_prefetch = 0 : i64, scratch_operands = 0 : i64, tpu.core_type = #tpu.core_type<tc>, window_params = [{transform_indices = @transform_0, window_bounds = array<i64: 256, 128>}, {pipeline_mode = #tpu.pipeline_mode<synchronous>, transform_indices = @transform_1, window_bounds = array<i64: 128, 128>}, {transform_indices = @transform_2, window_bounds = array<i64: 256, 128>}]} {
    %c0 = arith.constant 0 : index
    %c0_0 = arith.constant 0 : index
    %0 = vector.load %arg1[%c0, %c0_0] : memref<256x128xf32, #tpu.memory_space<vmem>>, vector<256x128xf32>
    %c0_1 = arith.constant 0 : index
    %c0_2 = arith.constant 0 : index
    %1 = vector.load %arg2[%c0_1, %c0_2] : memref<128x128xf32, #tpu.memory_space<vmem>>, vector<128x128xf32>
    %cst = arith.constant dense<0.000000e+00> : vector<256x128xf32>
    %2 = tpu.matmul %0, %1, %cst {dimension_numbers = #tpu.dot_dimension_numbers<[1], [0], [0], [1], [0, 0, 1, 1], [], []>} : vector<256x128xf32>, vector<128x128xf32>, vector<256x128xf32> -> vector<256x128xf32>
    %c0_3 = arith.constant 0 : index
    %c0_4 = arith.constant 0 : index
    %3 = vector.load %arg3[%c0_3, %c0_4] : memref<256x128xf32, #tpu.memory_space<vmem>>, vector<256x128xf32>
    tpu.vector_store %arg3[%c0_3, %c0_4], %2 {strides = array<i32>} : memref<256x128xf32, #tpu.memory_space<vmem>>, vector<256x128xf32>,
    return
  }
  func.func @transform_0(%arg0: i32) -> (i32, i32) {
    %c0_i32 = arith.constant 0 : i32
    %c0_i32_0 = arith.constant 0 : i32
    return %arg0, %c0_i32 : i32, i32
  }
  func.func @transform_1(%arg0: i32) -> (i32, i32) {
    %c0_i32 = arith.constant 0 : i32
    %c0_i32_0 = arith.constant 0 : i32
    %c0_i32_1 = arith.constant 0 : i32
    return %c0_i32, %c0_i32_0 : i32, i32
  }
  func.func @transform_2(%arg0: i32) -> (i32, i32) {
    %c0_i32 = arith.constant 0 : i32
    %c0_i32_0 = arith.constant 0 : i32
    return %arg0, %c0_i32 : i32, i32
  }
}

module attributes {stable_mosaic.version = 11 : i64} {
  func.func @_agg_inplace_kernel(%arg0: i32, %arg1: i32, %arg2: memref<256x256xf32, #tpu.memory_space<vmem>>, %arg3: memref<256x128xf32, #tpu.memory_space<vmem>>, %arg4: memref<1x128xf32, #tpu.memory_space<vmem>>, %arg5: memref<256x128xf32, #tpu.memory_space<vmem>>) attributes {dimension_semantics = [#tpu.dimension_semantics<parallel>, #tpu.dimension_semantics<arbitrary>], iteration_bounds = array<i64: 1, 1>, scalar_prefetch = 0 : i64, scratch_operands = 0 : i64, tpu.core_type = #tpu.core_type<tc>, window_params = [{transform_indices = @transform_0, window_bounds = array<i64: 256, 256>}, {pipeline_mode = #tpu.pipeline_mode<synchronous>, transform_indices = @transform_1, window_bounds = array<i64: 256, 128>}, {pipeline_mode = #tpu.pipeline_mode<synchronous>, transform_indices = @transform_2, window_bounds = array<i64: 1, 128>}, {transform_indices = @transform_3, window_bounds = array<i64: 256, 128>}]} {
    %c0_i32 = arith.constant 0 : i32
    %0 = arith.cmpi eq, %arg1, %c0_i32 : i32
    %1 = arith.extui %0 : i1 to i32
    %c0_i32_0 = arith.constant 0 : i32
    %2 = arith.cmpi ne, %1, %c0_i32_0 : i32
    scf.if %2 {
      %cst_9 = arith.constant 0.000000e+00 : f32
      %15 = vector.broadcast %cst_9 : f32 to vector<256x128xf32>
      %c0_10 = arith.constant 0 : index
      %c0_11 = arith.constant 0 : index
      %16 = vector.load %arg5[%c0_10, %c0_11] : memref<256x128xf32, #tpu.memory_space<vmem>>, vector<256x128xf32>
      tpu.vector_store %arg5[%c0_10, %c0_11], %15 {strides = array<i32>} : memref<256x128xf32, #tpu.memory_space<vmem>>, vector<256x128xf32>,
    } else {
    }
    %c256_i32 = arith.constant 256 : i32
    %3 = arith.muli %arg1, %c256_i32 : i32
    %4 = tpu.assume_multiple %3, 256 : i32
    %5 = arith.index_cast %4 : i32 to index
    %c0 = arith.constant 0 : index
    %6 = vector.load %arg3[%5, %c0] : memref<256x128xf32, #tpu.memory_space<vmem>>, vector<256x128xf32>
    %c0_1 = arith.constant 0 : index
    %c0_2 = arith.constant 0 : index
    %7 = vector.load %arg5[%c0_1, %c0_2] : memref<256x128xf32, #tpu.memory_space<vmem>>, vector<256x128xf32>
    %c0_3 = arith.constant 0 : index
    %c0_4 = arith.constant 0 : index
    %8 = vector.load %arg2[%c0_3, %c0_4] : memref<256x256xf32, #tpu.memory_space<vmem>>, vector<256x256xf32>
    %cst = arith.constant dense<0.000000e+00> : vector<256x128xf32>
    %9 = tpu.matmul %8, %6, %cst {dimension_numbers = #tpu.dot_dimension_numbers<[1], [0], [0], [1], [0, 0, 1, 1], [], []>} : vector<256x256xf32>, vector<256x128xf32>, vector<256x128xf32> -> vector<256x128xf32>
    %10 = arith.addf %7, %9 : vector<256x128xf32>
    %c0_5 = arith.constant 0 : index
    %c0_6 = arith.constant 0 : index
    %11 = vector.load %arg5[%c0_5, %c0_6] : memref<256x128xf32, #tpu.memory_space<vmem>>, vector<256x128xf32>
    tpu.vector_store %arg5[%c0_5, %c0_6], %10 {strides = array<i32>} : memref<256x128xf32, #tpu.memory_space<vmem>>, vector<256x128xf32>,
    %c0_i32_7 = arith.constant 0 : i32
    %12 = arith.cmpi eq, %arg1, %c0_i32_7 : i32
    %13 = arith.extui %12 : i1 to i32
    %c0_i32_8 = arith.constant 0 : i32
    %14 = arith.cmpi ne, %13, %c0_i32_8 : i32
    scf.if %14 {
      %c0_9 = arith.constant 0 : index
      %c0_10 = arith.constant 0 : index
      %15 = vector.load %arg5[%c0_9, %c0_10] : memref<256x128xf32, #tpu.memory_space<vmem>>, vector<256x128xf32>
      %c0_11 = arith.constant 0 : index
      %c0_12 = arith.constant 0 : index
      %16 = vector.load %arg4[%c0_11, %c0_12] : memref<1x128xf32, #tpu.memory_space<vmem>>, vector<1x128xf32>
      %17 = vector.broadcast %16 : vector<1x128xf32> to vector<256x128xf32>
      %18 = arith.addf %15, %17 : vector<256x128xf32>
      %cst_13 = arith.constant 0.000000e+00 : f32
      %19 = vector.broadcast %cst_13 : f32 to vector<256x128xf32>
      %20 = arith.maximumf %18, %19 : vector<256x128xf32>
      %c0_14 = arith.constant 0 : index
      %c0_15 = arith.constant 0 : index
      %21 = vector.load %arg5[%c0_14, %c0_15] : memref<256x128xf32, #tpu.memory_space<vmem>>, vector<256x128xf32>
      tpu.vector_store %arg5[%c0_14, %c0_15], %20 {strides = array<i32>} : memref<256x128xf32, #tpu.memory_space<vmem>>, vector<256x128xf32>,
    } else {
    }
    return
  }
  func.func @transform_0(%arg0: i32, %arg1: i32) -> (i32, i32) {
    %c0_i32 = arith.constant 0 : i32
    return %arg0, %arg1 : i32, i32
  }
  func.func @transform_1(%arg0: i32, %arg1: i32) -> (i32, i32) {
    %c0_i32 = arith.constant 0 : i32
    %c0_i32_0 = arith.constant 0 : i32
    %c0_i32_1 = arith.constant 0 : i32
    return %c0_i32, %c0_i32_0 : i32, i32
  }
  func.func @transform_2(%arg0: i32, %arg1: i32) -> (i32, i32) {
    %c0_i32 = arith.constant 0 : i32
    %c0_i32_0 = arith.constant 0 : i32
    %c0_i32_1 = arith.constant 0 : i32
    return %c0_i32, %c0_i32_0 : i32, i32
  }
  func.func @transform_3(%arg0: i32, %arg1: i32) -> (i32, i32) {
    %c0_i32 = arith.constant 0 : i32
    %c0_i32_0 = arith.constant 0 : i32
    return %arg0, %c0_i32 : i32, i32
  }
}

module attributes {stable_mosaic.version = 11 : i64} {
  func.func @_agg_inplace_kernel(%arg0: i32, %arg1: i32, %arg2: memref<256x256xf32, #tpu.memory_space<vmem>>, %arg3: memref<256x128xf32, #tpu.memory_space<vmem>>, %arg4: memref<1x128xf32, #tpu.memory_space<vmem>>, %arg5: memref<256x128xf32, #tpu.memory_space<vmem>>) attributes {dimension_semantics = [#tpu.dimension_semantics<parallel>, #tpu.dimension_semantics<arbitrary>], iteration_bounds = array<i64: 1, 1>, scalar_prefetch = 0 : i64, scratch_operands = 0 : i64, tpu.core_type = #tpu.core_type<tc>, window_params = [{transform_indices = @transform_0, window_bounds = array<i64: 256, 256>}, {pipeline_mode = #tpu.pipeline_mode<synchronous>, transform_indices = @transform_1, window_bounds = array<i64: 256, 128>}, {pipeline_mode = #tpu.pipeline_mode<synchronous>, transform_indices = @transform_2, window_bounds = array<i64: 1, 128>}, {transform_indices = @transform_3, window_bounds = array<i64: 256, 128>}]} {
    %c0_i32 = arith.constant 0 : i32
    %0 = arith.cmpi eq, %arg1, %c0_i32 : i32
    %1 = arith.extui %0 : i1 to i32
    %c0_i32_0 = arith.constant 0 : i32
    %2 = arith.cmpi ne, %1, %c0_i32_0 : i32
    scf.if %2 {
      %cst_9 = arith.constant 0.000000e+00 : f32
      %15 = vector.broadcast %cst_9 : f32 to vector<256x128xf32>
      %c0_10 = arith.constant 0 : index
      %c0_11 = arith.constant 0 : index
      %16 = vector.load %arg5[%c0_10, %c0_11] : memref<256x128xf32, #tpu.memory_space<vmem>>, vector<256x128xf32>
      tpu.vector_store %arg5[%c0_10, %c0_11], %15 {strides = array<i32>} : memref<256x128xf32, #tpu.memory_space<vmem>>, vector<256x128xf32>,
    } else {
    }
    %c256_i32 = arith.constant 256 : i32
    %3 = arith.muli %arg1, %c256_i32 : i32
    %4 = tpu.assume_multiple %3, 256 : i32
    %5 = arith.index_cast %4 : i32 to index
    %c0 = arith.constant 0 : index
    %6 = vector.load %arg3[%5, %c0] : memref<256x128xf32, #tpu.memory_space<vmem>>, vector<256x128xf32>
    %c0_1 = arith.constant 0 : index
    %c0_2 = arith.constant 0 : index
    %7 = vector.load %arg5[%c0_1, %c0_2] : memref<256x128xf32, #tpu.memory_space<vmem>>, vector<256x128xf32>
    %c0_3 = arith.constant 0 : index
    %c0_4 = arith.constant 0 : index
    %8 = vector.load %arg2[%c0_3, %c0_4] : memref<256x256xf32, #tpu.memory_space<vmem>>, vector<256x256xf32>
    %cst = arith.constant dense<0.000000e+00> : vector<256x128xf32>
    %9 = tpu.matmul %8, %6, %cst {dimension_numbers = #tpu.dot_dimension_numbers<[1], [0], [0], [1], [0, 0, 1, 1], [], []>} : vector<256x256xf32>, vector<256x128xf32>, vector<256x128xf32> -> vector<256x128xf32>
    %10 = arith.addf %7, %9 : vector<256x128xf32>
    %c0_5 = arith.constant 0 : index
    %c0_6 = arith.constant 0 : index
    %11 = vector.load %arg5[%c0_5, %c0_6] : memref<256x128xf32, #tpu.memory_space<vmem>>, vector<256x128xf32>
    tpu.vector_store %arg5[%c0_5, %c0_6], %10 {strides = array<i32>} : memref<256x128xf32, #tpu.memory_space<vmem>>, vector<256x128xf32>,
    %c0_i32_7 = arith.constant 0 : i32
    %12 = arith.cmpi eq, %arg1, %c0_i32_7 : i32
    %13 = arith.extui %12 : i1 to i32
    %c0_i32_8 = arith.constant 0 : i32
    %14 = arith.cmpi ne, %13, %c0_i32_8 : i32
    scf.if %14 {
      %c0_9 = arith.constant 0 : index
      %c0_10 = arith.constant 0 : index
      %15 = vector.load %arg5[%c0_9, %c0_10] : memref<256x128xf32, #tpu.memory_space<vmem>>, vector<256x128xf32>
      %c0_11 = arith.constant 0 : index
      %c0_12 = arith.constant 0 : index
      %16 = vector.load %arg4[%c0_11, %c0_12] : memref<1x128xf32, #tpu.memory_space<vmem>>, vector<1x128xf32>
      %17 = vector.broadcast %16 : vector<1x128xf32> to vector<256x128xf32>
      %18 = arith.addf %15, %17 : vector<256x128xf32>
      %cst_13 = arith.constant dense<0xFF800000> : vector<256xf32>
      %19 = vector.multi_reduction <maximumf>, %18, %cst_13 [1] : vector<256x128xf32> to vector<256xf32>
      %20 = vector.shape_cast %19 : vector<256xf32> to vector<256x1xf32>
      %21 = vector.broadcast %20 : vector<256x1xf32> to vector<256x128xf32>
      %22 = arith.subf %18, %21 : vector<256x128xf32>
      %23 = math.exp %22 : vector<256x128xf32>
      %cst_14 = arith.constant dense<0.000000e+00> : vector<256xf32>
      %24 = vector.multi_reduction <add>, %23, %cst_14 [1] : vector<256x128xf32> to vector<256xf32>
      %25 = vector.shape_cast %24 : vector<256xf32> to vector<256x1xf32>
      %26 = math.log %25 : vector<256x1xf32>
      %27 = vector.broadcast %26 : vector<256x1xf32> to vector<256x128xf32>
      %28 = arith.subf %22, %27 : vector<256x128xf32>
      %c0_15 = arith.constant 0 : index
      %c0_16 = arith.constant 0 : index
      %29 = vector.load %arg5[%c0_15, %c0_16] : memref<256x128xf32, #tpu.memory_space<vmem>>, vector<256x128xf32>
      tpu.vector_store %arg5[%c0_15, %c0_16], %28 {strides = array<i32>} : memref<256x128xf32, #tpu.memory_space<vmem>>, vector<256x128xf32>,
    } else {
    }
    return
  }
  func.func @transform_0(%arg0: i32, %arg1: i32) -> (i32, i32) {
    %c0_i32 = arith.constant 0 : i32
    return %arg0, %arg1 : i32, i32
  }
  func.func @transform_1(%arg0: i32, %arg1: i32) -> (i32, i32) {
    %c0_i32 = arith.constant 0 : i32
    %c0_i32_0 = arith.constant 0 : i32
    %c0_i32_1 = arith.constant 0 : i32
    return %c0_i32, %c0_i32_0 : i32, i32
  }
  func.func @transform_2(%arg0: i32, %arg1: i32) -> (i32, i32) {
    %c0_i32 = arith.constant 0 : i32
    %c0_i32_0 = arith.constant 0 : i32
    %c0_i32_1 = arith.constant 0 : i32
    return %c0_i32, %c0_i32_0 : i32, i32
  }
  func.func @transform_3(%arg0: i32, %arg1: i32) -> (i32, i32) {
    %c0_i32 = arith.constant 0 : i32
    %c0_i32_0 = arith.constant 0 : i32
    return %arg0, %c0_i32 : i32, i32
  }
}

</mosaic_0001>

<bundles_post_ra>
// kernel: gcn_forward.4
= control target key start
LH: loop header
LB: loop body
LE: loop exit
PB: predicated region body
PF: predicated region fallthrough
CT: control target
= control target key end

     0   :  { %s751_s1 = inlined_call_operand.vmem [shape: f32[128,128], index: 1, kind: input, shape index: {}]   ;;  %s752_s0 = inlined_call_operand.vmem [shape: f32[256,128], index: 0, kind: input, shape index: {}]   ;;  %s753_s2 = inlined_call_operand.vmem [shape: f32[256,128], index: 2, kind: output, shape index: {}]  }
   0x1   :  { %v43_v0 = vld [vmem:[%s751_s1] sm:$0xff]  ;;  %v44_v1 = vld [vmem:[%s751_s1 + $0x8] sm:$0xff]  ;;  %v45_v2 = vld [vmem:[%s751_s1 + $0x10] sm:$0xff] }
   0x2   :  { %v448_v3 = vpack.c.bf16 %v44_v1, %v43_v0  ;;  %v46_v4 = vld [vmem:[%s751_s1 + $0x18] sm:$0xff]  ;;  %v47_v6 = vld [vmem:[%s751_s1 + $0x20] sm:$0xff]  ;;  %v48_v7 = vld [vmem:[%s751_s1 + $0x28] sm:$0xff] }
   0x3   :  { %v452_v5 = vpack.c.bf16 %v46_v4, %v45_v2  ;;  %v456_v8 = vpack.c.bf16 %v48_v7, %v47_v6  ;;  %v11_v9 = vld [vmem:[%s752_s0] sm:$0xff]  ;;  %v49_v11 = vld [vmem:[%s751_s1 + $0x30] sm:$0xff]  ;;  %v50_v12 = vld [vmem:[%s751_s1 + $0x38] sm:$0xff] }
   0x4   :  { %449 = vmatprep.subr.bf16.mxu0 %v448_v3  ;;  %480 = vmatprep.subr.bf16.mxu1 %v448_v3  ;;  %v27_v10 = vld [vmem:[%s752_s0 + $0x80] sm:$0xff]  ;;  %v460_v13 = vpack.c.bf16 %v50_v12, %v49_v11  ;;  %v52_v15 = vld [vmem:[%s751_s1 + $0x48] sm:$0xff]  ;;  %v53_v17 = vld [vmem:[%s751_s1 + $0x50] sm:$0xff] }
   0x5   :  { %451 = vmatpush3.bf16.msra.mxu0 %v448_v3  ;;  %488 = vmatpush3.bf16.msra.mxu1 %v448_v3  ;;  %v51_v14 = vld [vmem:[%s751_s1 + $0x40] sm:$0xff]  ;;  %v54_v18 = vld [vmem:[%s751_s1 + $0x58] sm:$0xff]  ;;  %v56_v21 = vld [vmem:[%s751_s1 + $0x68] sm:$0xff] }
   0x6   :  { %453 = vmatprep.subr.bf16.mxu0 %v452_v5  ;;  %481 = vmatprep.subr.bf16.mxu1 %v452_v5  ;;  %v464_v16 = vpack.c.bf16 %v52_v15, %v51_v14  ;;  %v468_v19 = vpack.c.bf16 %v54_v18, %v53_v17  ;;  %v55_v20 = vld [vmem:[%s751_s1 + $0x60] sm:$0xff]  ;;  %v57_v23 = vld [vmem:[%s751_s1 + $0x70] sm:$0xff]  ;;  %v58_v24 = vld [vmem:[%s751_s1 + $0x78] sm:$0xff] }
   0x7   :  { %400 = vmatprep.mubr.f32.mxu0 %v11_v9  ;;  %424 = vmatprep.mubr.f32.mxu1 %v27_v10  ;;  %v472_v22 = vpack.c.bf16 %v56_v21, %v55_v20  ;;  %v476_v25 = vpack.c.bf16 %v58_v24, %v57_v23  ;;  %v12_v26 = vld [vmem:[%s752_s0 + $0x8] sm:$0xff]  ;;  %v13_v28 = vld [vmem:[%s752_s0 + $0x10] sm:$0xff]  ;;  %v14_v30 = vld [vmem:[%s752_s0 + $0x18] sm:$0xff] }
   0x8   :  { %v28_v27 = vld [vmem:[%s752_s0 + $0x88] sm:$0xff]  ;;  %v29_v29 = vld [vmem:[%s752_s0 + $0x90] sm:$0xff]  ;;  %v30_v31 = vld [vmem:[%s752_s0 + $0x98] sm:$0xff] }
   0x9   :  { %455 = vmatpush3.bf16.msra.mxu0 %v452_v5  ;;  %489 = vmatpush3.bf16.msra.mxu1 %v452_v5  ;;  %v15_v32 = vld [vmem:[%s752_s0 + $0x20] sm:$0xff]  ;;  %v16_v34 = vld [vmem:[%s752_s0 + $0x28] sm:$0xff]  ;;  %v17_v36 = vld [vmem:[%s752_s0 + $0x30] sm:$0xff] }
   0xa   :  { %457 = vmatprep.subr.bf16.mxu0 %v456_v8  ;;  %482 = vmatprep.subr.bf16.mxu1 %v456_v8  ;;  %v31_v33 = vld [vmem:[%s752_s0 + $0xa0] sm:$0xff]  ;;  %v32_v35 = vld [vmem:[%s752_s0 + $0xa8] sm:$0xff]  ;;  %v33_v37 = vld [vmem:[%s752_s0 + $0xb0] sm:$0xff] }
   0xb   :  { %v18_v38 = vld [vmem:[%s752_s0 + $0x38] sm:$0xff]  ;;  %v19_v40 = vld [vmem:[%s752_s0 + $0x40] sm:$0xff]  ;;  %v20_v42 = vld [vmem:[%s752_s0 + $0x48] sm:$0xff] }
   0xc   :  { %v34_v39 = vld [vmem:[%s752_s0 + $0xb8] sm:$0xff]  ;;  %v35_v41 = vld [vmem:[%s752_s0 + $0xc0] sm:$0xff]  ;;  %v36_v43 = vld [vmem:[%s752_s0 + $0xc8] sm:$0xff] }
   0xd   :  { %459 = vmatpush3.bf16.msra.mxu0 %v456_v8  ;;  %490 = vmatpush3.bf16.msra.mxu1 %v456_v8  ;;  %v21_v44 = vld [vmem:[%s752_s0 + $0x50] sm:$0xff]  ;;  %v22_v46 = vld [vmem:[%s752_s0 + $0x58] sm:$0xff]  ;;  %v23_v48 = vld [vmem:[%s752_s0 + $0x60] sm:$0xff] }
   0xe   :  { %461 = vmatprep.subr.bf16.mxu0 %v460_v13  ;;  %483 = vmatprep.subr.bf16.mxu1 %v460_v13  ;;  %v37_v45 = vld [vmem:[%s752_s0 + $0xd0] sm:$0xff]  ;;  %v38_v47 = vld [vmem:[%s752_s0 + $0xd8] sm:$0xff]  ;;  %v39_v49 = vld [vmem:[%s752_s0 + $0xe0] sm:$0xff] }
   0xf   :  { %v24_v50 = vld [vmem:[%s752_s0 + $0x68] sm:$0xff]  ;;  %v25_v52 = vld [vmem:[%s752_s0 + $0x70] sm:$0xff]  ;;  %v26_v54 = vld [vmem:[%s752_s0 + $0x78] sm:$0xff] }
  0x10   :  { %v40_v51 = vld [vmem:[%s752_s0 + $0xe8] sm:$0xff]  ;;  %v41_v53 = vld [vmem:[%s752_s0 + $0xf0] sm:$0xff]  ;;  %v42_v55 = vld [vmem:[%s752_s0 + $0xf8] sm:$0xff] }
  0x11   :  { %463 = vmatpush3.bf16.msra.mxu0 %v460_v13  ;;  %491 = vmatpush3.bf16.msra.mxu1 %v460_v13 }
  0x12   :  { %465 = vmatprep.subr.bf16.mxu0 %v464_v16  ;;  %484 = vmatprep.subr.bf16.mxu1 %v464_v16 }
  0x15   :  { %467 = vmatpush3.bf16.msra.mxu0 %v464_v16  ;;  %492 = vmatpush3.bf16.msra.mxu1 %v464_v16 }
  0x16   :  { %469 = vmatprep.subr.bf16.mxu0 %v468_v19  ;;  %485 = vmatprep.subr.bf16.mxu1 %v468_v19 }
  0x19   :  { %471 = vmatpush3.bf16.msra.mxu0 %v468_v19  ;;  %493 = vmatpush3.bf16.msra.mxu1 %v468_v19 }
  0x1a   :  { %473 = vmatprep.subr.bf16.mxu0 %v472_v22  ;;  %486 = vmatprep.subr.bf16.mxu1 %v472_v22 }
  0x1d   :  { %475 = vmatpush3.bf16.msra.mxu0 %v472_v22  ;;  %494 = vmatpush3.bf16.msra.mxu1 %v472_v22 }
  0x1e   :  { %477 = vmatprep.subr.bf16.mxu0 %v476_v25  ;;  %487 = vmatprep.subr.bf16.mxu1 %v476_v25 }
  0x21   :  { %479 = vmatpush3.bf16.msra.mxu0 %v476_v25  ;;  %495 = vmatpush3.bf16.msra.mxu1 %v476_v25 }
  0x24   :  { %401 = vmatmul.mubr.f32.vlgmr.msra.gmra.mrb[0].mxu0 %v12_v26  ;;  %425 = vmatmul.mubr.f32.vlgmr.msra.gmra.mrb[0].mxu1 %v28_v27 }
  0x25   :  { %403 = vmatprep.mubr.f32.mxu0 %v13_v28  ;;  %427 = vmatprep.mubr.f32.mxu1 %v29_v29 }
  0x28   :  { %404 = vmatmul.mubr.f32.gmra.mrb[2].mxu0 %v14_v30  ;;  %428 = vmatmul.mubr.f32.gmra.mrb[2].mxu1 %v30_v31 }
  0x29   :  { %406 = vmatprep.mubr.f32.mxu0 %v15_v32  ;;  %430 = vmatprep.mubr.f32.mxu1 %v31_v33 }
  0x2c   :  { %407 = vmatmul.mubr.f32.gmra.mrb[4].mxu0 %v16_v34  ;;  %431 = vmatmul.mubr.f32.gmra.mrb[4].mxu1 %v32_v35 }
  0x2d   :  { %409 = vmatprep.mubr.f32.mxu0 %v17_v36  ;;  %433 = vmatprep.mubr.f32.mxu1 %v33_v37 }
  0x30   :  { %410 = vmatmul.mubr.f32.gmra.mrb[6].mxu0 %v18_v38  ;;  %434 = vmatmul.mubr.f32.gmra.mrb[6].mxu1 %v34_v39 }
  0x31   :  { %412 = vmatprep.mubr.f32.mxu0 %v19_v40  ;;  %436 = vmatprep.mubr.f32.mxu1 %v35_v41 }
  0x34   :  { %413 = vmatmul.mubr.f32.gmra.mrb[8].mxu0 %v20_v42  ;;  %437 = vmatmul.mubr.f32.gmra.mrb[8].mxu1 %v36_v43 }
  0x35   :  { %415 = vmatprep.mubr.f32.mxu0 %v21_v44  ;;  %439 = vmatprep.mubr.f32.mxu1 %v37_v45 }
  0x38   :  { %416 = vmatmul.mubr.f32.gmra.mrb[10].mxu0 %v22_v46  ;;  %440 = vmatmul.mubr.f32.gmra.mrb[10].mxu1 %v38_v47 }
  0x39   :  { %418 = vmatprep.mubr.f32.mxu0 %v23_v48  ;;  %442 = vmatprep.mubr.f32.mxu1 %v39_v49 }
  0x3c   :  { %419 = vmatmul.mubr.f32.gmra.mrb[12].mxu0 %v24_v50  ;;  %443 = vmatmul.mubr.f32.gmra.mrb[12].mxu1 %v40_v51 }
  0x3d   :  { %421 = vmatprep.mubr.f32.mxu0 %v25_v52  ;;  %445 = vmatprep.mubr.f32.mxu1 %v41_v53 }
  0x40   :  { %422 = vmatmul.mubr.f32.gmra.mrb[14].mxu0 %v26_v54  ;;  %446 = vmatmul.mubr.f32.gmra.mrb[14].mxu1 %v42_v55 }
  0xf7   :  { %v402_v56 = vpop.f32.mrb[0].mxu0  ;;  %v426_v57 = vpop.f32.mrb[0].mxu1 }
  0xf8   :  { %285 = vst [vmem:[%s753_s2 + $0x8] sm:$0xff] %v402_v56  ;;  %301 = vst [vmem:[%s753_s2 + $0x88] sm:$0xff] %v426_v57  ;;  %v125_v58 = vpop.f32.mrb[1].mxu0  ;;  %v205_v59 = vpop.f32.mrb[1].mxu1 }
  0xf9   :  { %284 = vst [vmem:[%s753_s2] sm:$0xff] %v125_v58  ;;  %300 = vst [vmem:[%s753_s2 + $0x80] sm:$0xff] %v205_v59 }
  0xfb   :  { %v405_v60 = vpop.f32.mrb[2].mxu0  ;;  %v429_v61 = vpop.f32.mrb[2].mxu1 }
  0xfc   :  { %287 = vst [vmem:[%s753_s2 + $0x18] sm:$0xff] %v405_v60  ;;  %303 = vst [vmem:[%s753_s2 + $0x98] sm:$0xff] %v429_v61  ;;  %v135_v62 = vpop.f32.mrb[3].mxu0  ;;  %v215_v63 = vpop.f32.mrb[3].mxu1 }
  0xfd   :  { %286 = vst [vmem:[%s753_s2 + $0x10] sm:$0xff] %v135_v62  ;;  %302 = vst [vmem:[%s753_s2 + $0x90] sm:$0xff] %v215_v63 }
  0xff   :  { %v408_v0 = vpop.f32.mrb[4].mxu0  ;;  %v432_v1 = vpop.f32.mrb[4].mxu1 }
 0x100   :  { %289 = vst [vmem:[%s753_s2 + $0x28] sm:$0xff] %v408_v0  ;;  %305 = vst [vmem:[%s753_s2 + $0xa8] sm:$0xff] %v432_v1  ;;  %v145_v2 = vpop.f32.mrb[5].mxu0  ;;  %v225_v3 = vpop.f32.mrb[5].mxu1 }
 0x101   :  { %288 = vst [vmem:[%s753_s2 + $0x20] sm:$0xff] %v145_v2  ;;  %304 = vst [vmem:[%s753_s2 + $0xa0] sm:$0xff] %v225_v3 }
 0x103   :  { %v411_v4 = vpop.f32.mrb[6].mxu0  ;;  %v435_v5 = vpop.f32.mrb[6].mxu1 }
 0x104   :  { %291 = vst [vmem:[%s753_s2 + $0x38] sm:$0xff] %v411_v4  ;;  %307 = vst [vmem:[%s753_s2 + $0xb8] sm:$0xff] %v435_v5  ;;  %v155_v6 = vpop.f32.mrb[7].mxu0  ;;  %v235_v7 = vpop.f32.mrb[7].mxu1 }
 0x105   :  { %290 = vst [vmem:[%s753_s2 + $0x30] sm:$0xff] %v155_v6  ;;  %306 = vst [vmem:[%s753_s2 + $0xb0] sm:$0xff] %v235_v7 }
 0x107   :  { %v414_v8 = vpop.f32.mrb[8].mxu0  ;;  %v438_v9 = vpop.f32.mrb[8].mxu1 }
 0x108   :  { %293 = vst [vmem:[%s753_s2 + $0x48] sm:$0xff] %v414_v8  ;;  %309 = vst [vmem:[%s753_s2 + $0xc8] sm:$0xff] %v438_v9  ;;  %v165_v10 = vpop.f32.mrb[9].mxu0  ;;  %v245_v11 = vpop.f32.mrb[9].mxu1 }
 0x109   :  { %292 = vst [vmem:[%s753_s2 + $0x40] sm:$0xff] %v165_v10  ;;  %308 = vst [vmem:[%s753_s2 + $0xc0] sm:$0xff] %v245_v11 }
 0x10b   :  { %v417_v12 = vpop.f32.mrb[10].mxu0  ;;  %v441_v13 = vpop.f32.mrb[10].mxu1 }
 0x10c   :  { %295 = vst [vmem:[%s753_s2 + $0x58] sm:$0xff] %v417_v12  ;;  %311 = vst [vmem:[%s753_s2 + $0xd8] sm:$0xff] %v441_v13  ;;  %v175_v14 = vpop.f32.mrb[11].mxu0  ;;  %v255_v15 = vpop.f32.mrb[11].mxu1 }
 0x10d   :  { %294 = vst [vmem:[%s753_s2 + $0x50] sm:$0xff] %v175_v14  ;;  %310 = vst [vmem:[%s753_s2 + $0xd0] sm:$0xff] %v255_v15 }
 0x10f   :  { %v420_v16 = vpop.f32.mrb[12].mxu0  ;;  %v444_v17 = vpop.f32.mrb[12].mxu1 }
 0x110   :  { %297 = vst [vmem:[%s753_s2 + $0x68] sm:$0xff] %v420_v16  ;;  %313 = vst [vmem:[%s753_s2 + $0xe8] sm:$0xff] %v444_v17  ;;  %v185_v18 = vpop.f32.mrb[13].mxu0  ;;  %v265_v19 = vpop.f32.mrb[13].mxu1 }
 0x111   :  { %296 = vst [vmem:[%s753_s2 + $0x60] sm:$0xff] %v185_v18  ;;  %312 = vst [vmem:[%s753_s2 + $0xe0] sm:$0xff] %v265_v19 }
 0x113   :  { %v423_v20 = vpop.f32.mrb[14].mxu0  ;;  %v447_v21 = vpop.f32.mrb[14].mxu1 }
 0x114   :  { %299 = vst [vmem:[%s753_s2 + $0x78] sm:$0xff] %v423_v20  ;;  %315 = vst [vmem:[%s753_s2 + $0xf8] sm:$0xff] %v447_v21  ;;  %v195_v22 = vpop.f32.mrb[15].mxu0  ;;  %v275_v23 = vpop.f32.mrb[15].mxu1 }
 0x115   :  { %298 = vst [vmem:[%s753_s2 + $0x70] sm:$0xff] %v195_v22  ;;  %314 = vst [vmem:[%s753_s2 + $0xf0] sm:$0xff] %v275_v23 }

// kernel: gcn_forward.5
= control target key start
LH: loop header
LB: loop body
LE: loop exit
PB: predicated region body
PF: predicated region fallthrough
CT: control target
= control target key end

     0   :  { %8 = vsyncpa [#allocation3], 0  ;;  %s736_s12 = smov [#allocation2]   ;;  %s1033_s0 = inlined_call_operand.hbm [shape: f32[256,256], index: 0, kind: input, shape index: {}]   ;;  %s1034_s1 = inlined_call_operand.vmem [shape: f32[256,128], index: 1, kind: input, shape index: {}]   ;;  %s1035_s2 = inlined_call_operand.vmem [shape: f32[1,128], index: 2, kind: input, shape index: {}]   ;;  %s1036_s3 = inlined_call_operand.vmem [shape: f32[256,128], index: 3, kind: output, shape index: {}]  }
   0x1   :  { %s14_s13 = sshll.u32 %s736_s12, 4  ;;  %s712_s16 = scalar_lea.hbm %s1033_s0, 8192  ;;  %s15_s13 = int_to_ptr.vmem [resolvable:$true] %s14_s13 }
   0x2   :  { %p713_p0 = scmp.ne.s32.totalorder %s1033_s0, %s712_s16  ;;  %p716_p1 = scmp.lt.u32.totalorder %s712_s16, %s1033_s0 }
   0x4   :  { %p718_p2 = pnand %p716_p1, %p713_p0 }
   0x6   :  { %721 = shalt.err (!%p718_p2)
}
   0x7   :  { %s722_s21 = scalar_lea.vmem %s15_s13, 8192  ;;  %p727_p4 = scmp.lt.s32.totalorder %s15_s13, %s15_s13 }
   0x8   :  { %p723_p3 = scmp.ne.s32.totalorder %s15_s13, %s722_s21  ;;  %p728_p5 = scmp.lt.s32.totalorder %s722_s21, %s722_s21 }
   0xa   :  { %p729_p6 = por %p728_p5, %p727_p4 }
   0xc   :  { %p730_p7 = pnand %p729_p6, %p723_p3 }
   0xe   :  { %733 = shalt.err (!%p730_p7)
}
   0xf   :  { %s737_s22 = smov 256   ;;  %s738_s23 = smov 16  }
  0x10   :  { %20 = dma.hbm_to_vmem [thread:$0]  %s1033_s0, 8192, %s15_s13, [#allocation3], %s737_s22, %s737_s22, %s738_s23  }
  0x11   :  { %734 = dma.done.wait [#allocation3], 8192  }
  0x12   :  { %735 = vsyncadd [#allocation3], 4294959104  ;;  %v739_v0 = vmov 0.0|0.0   ;;  %v66_v1 = vld [vmem:[%s1034_s1] sm:$0xff]  ;;  %v67_v2 = vld [vmem:[%s1034_s1 + $0x8] sm:$0xff] }
  0x13   :  { %627 = vmatprep.subr.bf16.mxu0 %v739_v0  ;;  %675 = vmatprep.subr.bf16.mxu1 %v739_v0  ;;  %v68_v3 = vld [vmem:[%s1034_s1 + $0x10] sm:$0xff]  ;;  %v628_v4 = vpack.c.bf16 %v67_v2, %v66_v1  ;;  %v69_v5 = vld [vmem:[%s1034_s1 + $0x18] sm:$0xff]  ;;  %v70_v7 = vld [vmem:[%s1034_s1 + $0x20] sm:$0xff] }
  0x14   :  { %v631_v6 = vpack.c.bf16 %v69_v5, %v68_v3  ;;  %v71_v8 = vld [vmem:[%s1034_s1 + $0x28] sm:$0xff]  ;;  %v72_v10 = vld [vmem:[%s1034_s1 + $0x30] sm:$0xff]  ;;  %v73_v11 = vld [vmem:[%s1034_s1 + $0x38] sm:$0xff] }
  0x15   :  { %629 = vmatpush1.bf16.msra.mxu0 %v628_v4  ;;  %691 = vmatpush1.bf16.msra.mxu1 %v628_v4  ;;  %v634_v9 = vpack.c.bf16 %v71_v8, %v70_v7  ;;  %v131_v12 = vld [vmem:[#allocation2 + $0x8] sm:$0xff]  ;;  %v637_v13 = vpack.c.bf16 %v73_v11, %v72_v10  ;;  %v74_v15 = vld [vmem:[%s1034_s1 + $0x40] sm:$0xff]  ;;  %v76_v18 = vld [vmem:[%s1034_s1 + $0x50] sm:$0xff] }
  0x16   :  { %630 = vmatprep.subr.bf16.mxu0 %v739_v0  ;;  %676 = vmatprep.subr.bf16.mxu1 %v739_v0  ;;  %v163_v14 = vld [vmem:[#allocation2 + $0x108] sm:$0xff]  ;;  %v77_v19 = vld [vmem:[%s1034_s1 + $0x58] sm:$0xff]  ;;  %v78_v21 = vld [vmem:[%s1034_s1 + $0x60] sm:$0xff] }
  0x17   :  { %v75_v16 = vld [vmem:[%s1034_s1 + $0x48] sm:$0xff]  ;;  %258 = vmatprep.mubr.f32.mxu0 %v131_v12  ;;  %338 = vmatprep.mubr.f32.mxu1 %v163_v14  ;;  %v643_v20 = vpack.c.bf16 %v77_v19, %v76_v18  ;;  %v80_v24 = vld [vmem:[%s1034_s1 + $0x70] sm:$0xff]  ;;  %v81_v25 = vld [vmem:[%s1034_s1 + $0x78] sm:$0xff] }
  0x18   :  { %v640_v17 = vpack.c.bf16 %v75_v16, %v74_v15  ;;  %v79_v22 = vld [vmem:[%s1034_s1 + $0x68] sm:$0xff]  ;;  %v649_v26 = vpack.c.bf16 %v81_v25, %v80_v24  ;;  %v82_v27 = vld [vmem:[%s1034_s1 + $0x80] sm:$0xff]  ;;  %v84_v30 = vld [vmem:[%s1034_s1 + $0x90] sm:$0xff] }
  0x19   :  { %632 = vmatpush1.bf16.msra.mxu0 %v631_v6  ;;  %692 = vmatpush1.bf16.msra.mxu1 %v631_v6  ;;  %v646_v23 = vpack.c.bf16 %v79_v22, %v78_v21  ;;  %v83_v28 = vld [vmem:[%s1034_s1 + $0x88] sm:$0xff]  ;;  %v85_v31 = vld [vmem:[%s1034_s1 + $0x98] sm:$0xff]  ;;  %v86_v33 = vld [vmem:[%s1034_s1 + $0xa0] sm:$0xff] }
  0x1a   :  { %633 = vmatprep.subr.bf16.mxu0 %v739_v0  ;;  %677 = vmatprep.subr.bf16.mxu1 %v739_v0  ;;  %v652_v29 = vpack.c.bf16 %v83_v28, %v82_v27  ;;  %v655_v32 = vpack.c.bf16 %v85_v31, %v84_v30  ;;  %v87_v34 = vld [vmem:[%s1034_s1 + $0xa8] sm:$0xff]  ;;  %v88_v36 = vld [vmem:[%s1034_s1 + $0xb0] sm:$0xff]  ;;  %v89_v37 = vld [vmem:[%s1034_s1 + $0xb8] sm:$0xff] }
  0x1b   :  { %v658_v35 = vpack.c.bf16 %v87_v34, %v86_v33  ;;  %v661_v38 = vpack.c.bf16 %v89_v37, %v88_v36  ;;  %v90_v39 = vld [vmem:[%s1034_s1 + $0xc0] sm:$0xff]  ;;  %v91_v40 = vld [vmem:[%s1034_s1 + $0xc8] sm:$0xff]  ;;  %v92_v42 = vld [vmem:[%s1034_s1 + $0xd0] sm:$0xff] }
  0x1c   :  { %v664_v41 = vpack.c.bf16 %v91_v40, %v90_v39  ;;  %v93_v43 = vld [vmem:[%s1034_s1 + $0xd8] sm:$0xff]  ;;  %v94_v45 = vld [vmem:[%s1034_s1 + $0xe0] sm:$0xff]  ;;  %v95_v46 = vld [vmem:[%s1034_s1 + $0xe8] sm:$0xff] }
  0x1d   :  { %635 = vmatpush1.bf16.msra.mxu0 %v634_v9  ;;  %693 = vmatpush1.bf16.msra.mxu1 %v634_v9  ;;  %v667_v44 = vpack.c.bf16 %v93_v43, %v92_v42  ;;  %v670_v47 = vpack.c.bf16 %v95_v46, %v94_v45  ;;  %v96_v48 = vld [vmem:[%s1034_s1 + $0xf0] sm:$0xff]  ;;  %v97_v49 = vld [vmem:[%s1034_s1 + $0xf8] sm:$0xff]  ;;  %v130_v51 = vld [vmem:[#allocation2] sm:$0xff] }
  0x1e   :  { %636 = vmatprep.subr.bf16.mxu0 %v739_v0  ;;  %678 = vmatprep.subr.bf16.mxu1 %v739_v0  ;;  %v673_v50 = vpack.c.bf16 %v97_v49, %v96_v48  ;;  %v162_v52 = vld [vmem:[#allocation2 + $0x100] sm:$0xff]  ;;  %v133_v53 = vld [vmem:[#allocation2 + $0x18] sm:$0xff]  ;;  %v132_v55 = vld [vmem:[#allocation2 + $0x10] sm:$0xff] }
  0x1f   :  { %v165_v54 = vld [vmem:[#allocation2 + $0x118] sm:$0xff]  ;;  %v164_v56 = vld [vmem:[#allocation2 + $0x110] sm:$0xff]  ;;  %v135_v57 = vld [vmem:[#allocation2 + $0x28] sm:$0xff] }
  0x20   :  { %v167_v58 = vld [vmem:[#allocation2 + $0x128] sm:$0xff]  ;;  %v134_v59 = vld [vmem:[#allocation2 + $0x20] sm:$0xff]  ;;  %v137_v61 = vld [vmem:[#allocation2 + $0x38] sm:$0xff] }
  0x21   :  { %638 = vmatpush1.bf16.msra.mxu0 %v637_v13  ;;  %694 = vmatpush1.bf16.msra.mxu1 %v637_v13  ;;  %v166_v60 = vld [vmem:[#allocation2 + $0x120] sm:$0xff]  ;;  %v169_v62 = vld [vmem:[#allocation2 + $0x138] sm:$0xff]  ;;  %v136_v63 = vld [vmem:[#allocation2 + $0x30] sm:$0xff] }
  0x22   :  { %639 = vmatprep.subr.bf16.mxu0 %v739_v0  ;;  %679 = vmatprep.subr.bf16.mxu1 %v739_v0  ;;  %v139_v1 = vld [vmem:[#allocation2 + $0x48] sm:$0xff]  ;;  %v138_v3 = vld [vmem:[#allocation2 + $0x40] sm:$0xff]  ;;  %v141_v5 = vld [vmem:[#allocation2 + $0x58] sm:$0xff] }
  0x23   :  { %v171_v2 = vld [vmem:[#allocation2 + $0x148] sm:$0xff]  ;;  %v170_v4 = vld [vmem:[#allocation2 + $0x140] sm:$0xff]  ;;  %v173_v6 = vld [vmem:[#allocation2 + $0x158] sm:$0xff] }
  0x24   :  { %v140_v7 = vld [vmem:[#allocation2 + $0x50] sm:$0xff]  ;;  %v143_v9 = vld [vmem:[#allocation2 + $0x68] sm:$0xff]  ;;  %v142_v11 = vld [vmem:[#allocation2 + $0x60] sm:$0xff] }
  0x25   :  { %641 = vmatpush1.bf16.msra.mxu0 %v640_v17  ;;  %695 = vmatpush1.bf16.msra.mxu1 %v640_v17  ;;  %v172_v8 = vld [vmem:[#allocation2 + $0x150] sm:$0xff]  ;;  %v175_v10 = vld [vmem:[#allocation2 + $0x168] sm:$0xff]  ;;  %v174_v12 = vld [vmem:[#allocation2 + $0x160] sm:$0xff] }
  0x26   :  { %642 = vmatprep.subr.bf16.mxu0 %v739_v0  ;;  %680 = vmatprep.subr.bf16.mxu1 %v739_v0  ;;  %v145_v13 = vld [vmem:[#allocation2 + $0x78] sm:$0xff]  ;;  %v144_v15 = vld [vmem:[#allocation2 + $0x70] sm:$0xff]  ;;  %v147_v17 = vld [vmem:[#allocation2 + $0x88] sm:$0xff] }
  0x27   :  { %v177_v14 = vld [vmem:[#allocation2 + $0x178] sm:$0xff]  ;;  %v176_v16 = vld [vmem:[#allocation2 + $0x170] sm:$0xff]  ;;  %v179_v18 = vld [vmem:[#allocation2 + $0x188] sm:$0xff] }
  0x28   :  { %v146_v19 = vld [vmem:[#allocation2 + $0x80] sm:$0xff]  ;;  %v149_v21 = vld [vmem:[#allocation2 + $0x98] sm:$0xff]  ;;  %v180_v24 = vld [vmem:[#allocation2 + $0x190] sm:$0xff] }
  0x29   :  { %644 = vmatpush1.bf16.msra.mxu0 %v643_v20  ;;  %696 = vmatpush1.bf16.msra.mxu1 %v643_v20  ;;  %v178_v20 = vld [vmem:[#allocation2 + $0x180] sm:$0xff]  ;;  %v181_v22 = vld [vmem:[#allocation2 + $0x198] sm:$0xff]  ;;  %v151_v25 = vld [vmem:[#allocation2 + $0xa8] sm:$0xff] }
  0x2a   :  { %645 = vmatprep.subr.bf16.mxu0 %v739_v0  ;;  %681 = vmatprep.subr.bf16.mxu1 %v739_v0  ;;  %v150_v27 = vld [vmem:[#allocation2 + $0xa0] sm:$0xff]  ;;  %v185_v30 = vld [vmem:[#allocation2 + $0x1b8] sm:$0xff]  ;;  %v152_v31 = vld [vmem:[#allocation2 + $0xb0] sm:$0xff] }
  0x2b   :  { %v182_v28 = vld [vmem:[#allocation2 + $0x1a0] sm:$0xff]  ;;  %v155_v33 = vld [vmem:[#allocation2 + $0xc8] sm:$0xff]  ;;  %v157_v37 = vld [vmem:[#allocation2 + $0xd8] sm:$0xff] }
  0x2c   :  { %v187_v34 = vld [vmem:[#allocation2 + $0x1c8] sm:$0xff]  ;;  %v186_v36 = vld [vmem:[#allocation2 + $0x1c0] sm:$0xff]  ;;  %v156_v39 = vld [vmem:[#allocation2 + $0xd0] sm:$0xff] }
  0x2d   :  { %647 = vmatpush1.bf16.msra.mxu0 %v646_v23  ;;  %697 = vmatpush1.bf16.msra.mxu1 %v646_v23  ;;  %v148_v23 = vld [vmem:[#allocation2 + $0x90] sm:$0xff]  ;;  %v191_v42 = vld [vmem:[#allocation2 + $0x1e8] sm:$0xff]  ;;  %v158_v43 = vld [vmem:[#allocation2 + $0xe0] sm:$0xff] }
  0x2e   :  { %648 = vmatprep.subr.bf16.mxu0 %v739_v0  ;;  %682 = vmatprep.subr.bf16.mxu1 %v739_v0  ;;  %v188_v40 = vld [vmem:[#allocation2 + $0x1d0] sm:$0xff]  ;;  %v161_v45 = vld [vmem:[#allocation2 + $0xf8] sm:$0xff] }
  0x2f   :  { %v193_v46 = vld [vmem:[#allocation2 + $0x1f8] sm:$0xff]  ;;  %v192_v48 = vld [vmem:[#allocation2 + $0x1f0] sm:$0xff] }
  0x31   :  { %650 = vmatpush1.bf16.msra.mxu0 %v649_v26  ;;  %698 = vmatpush1.bf16.msra.mxu1 %v649_v26  ;;  %v183_v26 = vld [vmem:[#allocation2 + $0x1a8] sm:$0xff] }
  0x32   :  { %651 = vmatprep.subr.bf16.mxu0 %v739_v0  ;;  %683 = vmatprep.subr.bf16.mxu1 %v739_v0 }
  0x35   :  { %653 = vmatpush1.bf16.msra.mxu0 %v652_v29  ;;  %699 = vmatpush1.bf16.msra.mxu1 %v652_v29  ;;  %v153_v29 = vld [vmem:[#allocation2 + $0xb8] sm:$0xff] }
  0x36   :  { %654 = vmatprep.subr.bf16.mxu0 %v739_v0  ;;  %684 = vmatprep.subr.bf16.mxu1 %v739_v0 }
  0x39   :  { %656 = vmatpush1.bf16.msra.mxu0 %v655_v32  ;;  %700 = vmatpush1.bf16.msra.mxu1 %v655_v32  ;;  %v184_v32 = vld [vmem:[#allocation2 + $0x1b0] sm:$0xff] }
  0x3a   :  { %657 = vmatprep.subr.bf16.mxu0 %v739_v0  ;;  %685 = vmatprep.subr.bf16.mxu1 %v739_v0 }
  0x3d   :  { %659 = vmatpush1.bf16.msra.mxu0 %v658_v35  ;;  %701 = vmatpush1.bf16.msra.mxu1 %v658_v35  ;;  %v154_v35 = vld [vmem:[#allocation2 + $0xc0] sm:$0xff] }
  0x3e   :  { %660 = vmatprep.subr.bf16.mxu0 %v739_v0  ;;  %686 = vmatprep.subr.bf16.mxu1 %v739_v0 }
  0x41   :  { %662 = vmatpush1.bf16.msra.mxu0 %v661_v38  ;;  %702 = vmatpush1.bf16.msra.mxu1 %v661_v38  ;;  %v189_v38 = vld [vmem:[#allocation2 + $0x1d8] sm:$0xff] }
  0x42   :  { %663 = vmatprep.subr.bf16.mxu0 %v739_v0  ;;  %687 = vmatprep.subr.bf16.mxu1 %v739_v0 }
  0x45   :  { %665 = vmatpush1.bf16.msra.mxu0 %v664_v41  ;;  %703 = vmatpush1.bf16.msra.mxu1 %v664_v41  ;;  %v159_v41 = vld [vmem:[#allocation2 + $0xe8] sm:$0xff] }
  0x46   :  { %666 = vmatprep.subr.bf16.mxu0 %v739_v0  ;;  %688 = vmatprep.subr.bf16.mxu1 %v739_v0 }
  0x49   :  { %668 = vmatpush1.bf16.msra.mxu0 %v667_v44  ;;  %704 = vmatpush1.bf16.msra.mxu1 %v667_v44  ;;  %v190_v44 = vld [vmem:[#allocation2 + $0x1e0] sm:$0xff] }
  0x4a   :  { %669 = vmatprep.subr.bf16.mxu0 %v739_v0  ;;  %689 = vmatprep.subr.bf16.mxu1 %v739_v0 }
  0x4d   :  { %671 = vmatpush1.bf16.msra.mxu0 %v670_v47  ;;  %705 = vmatpush1.bf16.msra.mxu1 %v670_v47  ;;  %v160_v47 = vld [vmem:[#allocation2 + $0xf0] sm:$0xff] }
  0x4e   :  { %672 = vmatprep.subr.bf16.mxu0 %v739_v0  ;;  %690 = vmatprep.subr.bf16.mxu1 %v739_v0  ;;  %v168_v0 = vld [vmem:[#allocation2 + $0x130] sm:$0xff] }
  0x51   :  { %674 = vmatpush1.bf16.msra.mxu0 %v673_v50  ;;  %706 = vmatpush1.bf16.msra.mxu1 %v673_v50  ;;  %v903_v50 = vld [vmem:[%s1035_s2] ss:$0 sm:$0xff] }
  0x54   :  { %259 = vmatmul.mubr.f32.vlgmr.msra.gmra.mrb[0].mxu0 %v130_v51  ;;  %339 = vmatmul.mubr.f32.vlgmr.msra.gmra.mrb[0].mxu1 %v162_v52 }
  0x55   :  { %263 = vmatprep.mubr.f32.mxu0 %v133_v53  ;;  %343 = vmatprep.mubr.f32.mxu1 %v165_v54 }
  0x58   :  { %264 = vmatmul.mubr.f32.gmra.mrb[2].mxu0 %v132_v55  ;;  %344 = vmatmul.mubr.f32.gmra.mrb[2].mxu1 %v164_v56 }
  0x59   :  { %268 = vmatprep.mubr.f32.mxu0 %v135_v57  ;;  %348 = vmatprep.mubr.f32.mxu1 %v167_v58 }
  0x5c   :  { %269 = vmatmul.mubr.f32.gmra.mrb[4].mxu0 %v134_v59  ;;  %349 = vmatmul.mubr.f32.gmra.mrb[4].mxu1 %v166_v60 }
  0x5d   :  { %273 = vmatprep.mubr.f32.mxu0 %v137_v61  ;;  %353 = vmatprep.mubr.f32.mxu1 %v169_v62 }
  0x60   :  { %274 = vmatmul.mubr.f32.gmra.mrb[6].mxu0 %v136_v63  ;;  %354 = vmatmul.mubr.f32.gmra.mrb[6].mxu1 %v168_v0 }
  0x61   :  { %278 = vmatprep.mubr.f32.mxu0 %v139_v1  ;;  %358 = vmatprep.mubr.f32.mxu1 %v171_v2 }
  0x64   :  { %279 = vmatmul.mubr.f32.gmra.mrb[8].mxu0 %v138_v3  ;;  %359 = vmatmul.mubr.f32.gmra.mrb[8].mxu1 %v170_v4 }
  0x65   :  { %283 = vmatprep.mubr.f32.mxu0 %v141_v5  ;;  %363 = vmatprep.mubr.f32.mxu1 %v173_v6 }
  0x68   :  { %284 = vmatmul.mubr.f32.gmra.mrb[10].mxu0 %v140_v7  ;;  %364 = vmatmul.mubr.f32.gmra.mrb[10].mxu1 %v172_v8 }
  0x69   :  { %288 = vmatprep.mubr.f32.mxu0 %v143_v9  ;;  %368 = vmatprep.mubr.f32.mxu1 %v175_v10 }
  0x6c   :  { %289 = vmatmul.mubr.f32.gmra.mrb[12].mxu0 %v142_v11  ;;  %369 = vmatmul.mubr.f32.gmra.mrb[12].mxu1 %v174_v12 }
  0x6d   :  { %293 = vmatprep.mubr.f32.mxu0 %v145_v13  ;;  %373 = vmatprep.mubr.f32.mxu1 %v177_v14 }
  0x70   :  { %294 = vmatmul.mubr.f32.gmra.mrb[14].mxu0 %v144_v15  ;;  %374 = vmatmul.mubr.f32.gmra.mrb[14].mxu1 %v176_v16 }
  0x71   :  { %298 = vmatprep.mubr.f32.mxu0 %v147_v17  ;;  %378 = vmatprep.mubr.f32.mxu1 %v179_v18 }
  0x74   :  { %299 = vmatmul.mubr.f32.gmra.mrb[16].mxu0 %v146_v19  ;;  %379 = vmatmul.mubr.f32.gmra.mrb[16].mxu1 %v178_v20 }
  0x75   :  { %303 = vmatprep.mubr.f32.mxu0 %v149_v21  ;;  %383 = vmatprep.mubr.f32.mxu1 %v181_v22 }
  0x78   :  { %304 = vmatmul.mubr.f32.gmra.mrb[18].mxu0 %v148_v23  ;;  %384 = vmatmul.mubr.f32.gmra.mrb[18].mxu1 %v180_v24 }
  0x79   :  { %308 = vmatprep.mubr.f32.mxu0 %v151_v25  ;;  %388 = vmatprep.mubr.f32.mxu1 %v183_v26 }
  0x7c   :  { %309 = vmatmul.mubr.f32.gmra.mrb[20].mxu0 %v150_v27  ;;  %389 = vmatmul.mubr.f32.gmra.mrb[20].mxu1 %v182_v28 }
  0x7d   :  { %313 = vmatprep.mubr.f32.mxu0 %v153_v29  ;;  %393 = vmatprep.mubr.f32.mxu1 %v185_v30 }
  0x80   :  { %314 = vmatmul.mubr.f32.gmra.mrb[22].mxu0 %v152_v31  ;;  %394 = vmatmul.mubr.f32.gmra.mrb[22].mxu1 %v184_v32 }
  0x81   :  { %318 = vmatprep.mubr.f32.mxu0 %v155_v33  ;;  %398 = vmatprep.mubr.f32.mxu1 %v187_v34 }
  0x84   :  { %319 = vmatmul.mubr.f32.gmra.mrb[24].mxu0 %v154_v35  ;;  %399 = vmatmul.mubr.f32.gmra.mrb[24].mxu1 %v186_v36 }
  0x85   :  { %323 = vmatprep.mubr.f32.mxu0 %v157_v37  ;;  %403 = vmatprep.mubr.f32.mxu1 %v189_v38 }
  0x88   :  { %324 = vmatmul.mubr.f32.gmra.mrb[26].mxu0 %v156_v39  ;;  %404 = vmatmul.mubr.f32.gmra.mrb[26].mxu1 %v188_v40 }
  0x89   :  { %328 = vmatprep.mubr.f32.mxu0 %v159_v41  ;;  %408 = vmatprep.mubr.f32.mxu1 %v191_v42 }
  0x8c   :  { %329 = vmatmul.mubr.f32.gmra.mrb[28].mxu0 %v158_v43  ;;  %409 = vmatmul.mubr.f32.gmra.mrb[28].mxu1 %v190_v44 }
  0x8d   :  { %333 = vmatprep.mubr.f32.mxu0 %v161_v45  ;;  %413 = vmatprep.mubr.f32.mxu1 %v193_v46 }
  0x90   :  { %334 = vmatmul.mubr.f32.gmra.mrb[30].mxu0 %v160_v47  ;;  %414 = vmatmul.mubr.f32.gmra.mrb[30].mxu1 %v192_v48 }
 0x127   :  { %v260_v49 = vpop.f32.mrb[0].mxu0  ;;  %v340_v51 = vpop.f32.mrb[0].mxu1 }
 0x128   :  { %v262_v52 = vpop.f32.mrb[1].mxu0  ;;  %v342_v53 = vpop.f32.mrb[1].mxu1  ;;  %v525_v54 = vadd.f32 %v903_v50, %v260_v49  ;;  %v541_v55 = vadd.f32 %v903_v50, %v340_v51 }
 0x12a   :  { %v557_v58 = vmax.f32 %v525_v54, 0.0  ;;  %v573_v59 = vmax.f32 %v541_v55, 0.0 }
 0x12b   :  { %v265_v56 = vpop.f32.mrb[2].mxu0  ;;  %v345_v57 = vpop.f32.mrb[2].mxu1 }
 0x12c   :  { %v267_v60 = vpop.f32.mrb[3].mxu0  ;;  %v347_v61 = vpop.f32.mrb[3].mxu1  ;;  %589 = vst [vmem:[%s1036_s3] sm:$0xff] %v557_v58  ;;  %605 = vst [vmem:[%s1036_s3 + $0x80] sm:$0xff] %v573_v59  ;;  %v526_v62 = vadd.f32 %v903_v50, %v265_v56  ;;  %v542_v63 = vadd.f32 %v903_v50, %v345_v57 }
 0x12e   :  { %v558_v2 = vmax.f32 %v526_v62, 0.0  ;;  %v574_v3 = vmax.f32 %v542_v63, 0.0 }
 0x12f   :  { %v270_v0 = vpop.f32.mrb[4].mxu0  ;;  %v350_v1 = vpop.f32.mrb[4].mxu1 }
 0x130   :  { %v272_v4 = vpop.f32.mrb[5].mxu0  ;;  %v352_v5 = vpop.f32.mrb[5].mxu1  ;;  %590 = vst [vmem:[%s1036_s3 + $0x8] sm:$0xff] %v558_v2  ;;  %606 = vst [vmem:[%s1036_s3 + $0x88] sm:$0xff] %v574_v3  ;;  %v527_v6 = vadd.f32 %v903_v50, %v270_v0  ;;  %v543_v7 = vadd.f32 %v903_v50, %v350_v1 }
 0x132   :  { %v559_v10 = vmax.f32 %v527_v6, 0.0  ;;  %v575_v11 = vmax.f32 %v543_v7, 0.0 }
 0x133   :  { %v275_v8 = vpop.f32.mrb[6].mxu0  ;;  %v355_v9 = vpop.f32.mrb[6].mxu1 }
 0x134   :  { %v277_v12 = vpop.f32.mrb[7].mxu0  ;;  %v357_v13 = vpop.f32.mrb[7].mxu1  ;;  %591 = vst [vmem:[%s1036_s3 + $0x10] sm:$0xff] %v559_v10  ;;  %607 = vst [vmem:[%s1036_s3 + $0x90] sm:$0xff] %v575_v11  ;;  %v528_v14 = vadd.f32 %v903_v50, %v275_v8  ;;  %v544_v15 = vadd.f32 %v903_v50, %v355_v9 }
 0x136   :  { %v560_v18 = vmax.f32 %v528_v14, 0.0  ;;  %v576_v19 = vmax.f32 %v544_v15, 0.0 }
 0x137   :  { %v280_v16 = vpop.f32.mrb[8].mxu0  ;;  %v360_v17 = vpop.f32.mrb[8].mxu1 }
 0x138   :  { %v282_v20 = vpop.f32.mrb[9].mxu0  ;;  %v362_v21 = vpop.f32.mrb[9].mxu1  ;;  %592 = vst [vmem:[%s1036_s3 + $0x18] sm:$0xff] %v560_v18  ;;  %608 = vst [vmem:[%s1036_s3 + $0x98] sm:$0xff] %v576_v19  ;;  %v529_v22 = vadd.f32 %v903_v50, %v280_v16  ;;  %v545_v23 = vadd.f32 %v903_v50, %v360_v17 }
 0x13a   :  { %v561_v26 = vmax.f32 %v529_v22, 0.0  ;;  %v577_v27 = vmax.f32 %v545_v23, 0.0 }
 0x13b   :  { %v285_v24 = vpop.f32.mrb[10].mxu0  ;;  %v365_v25 = vpop.f32.mrb[10].mxu1 }
 0x13c   :  { %v287_v28 = vpop.f32.mrb[11].mxu0  ;;  %v367_v29 = vpop.f32.mrb[11].mxu1  ;;  %593 = vst [vmem:[%s1036_s3 + $0x20] sm:$0xff] %v561_v26  ;;  %609 = vst [vmem:[%s1036_s3 + $0xa0] sm:$0xff] %v577_v27  ;;  %v530_v30 = vadd.f32 %v903_v50, %v285_v24  ;;  %v546_v31 = vadd.f32 %v903_v50, %v365_v25 }
 0x13e   :  { %v562_v34 = vmax.f32 %v530_v30, 0.0  ;;  %v578_v35 = vmax.f32 %v546_v31, 0.0 }
 0x13f   :  { %v290_v32 = vpop.f32.mrb[12].mxu0  ;;  %v370_v33 = vpop.f32.mrb[12].mxu1 }
 0x140   :  { %v292_v36 = vpop.f32.mrb[13].mxu0  ;;  %v372_v37 = vpop.f32.mrb[13].mxu1  ;;  %594 = vst [vmem:[%s1036_s3 + $0x28] sm:$0xff] %v562_v34  ;;  %610 = vst [vmem:[%s1036_s3 + $0xa8] sm:$0xff] %v578_v35  ;;  %v531_v38 = vadd.f32 %v903_v50, %v290_v32  ;;  %v547_v39 = vadd.f32 %v903_v50, %v370_v33 }
 0x142   :  { %v563_v42 = vmax.f32 %v531_v38, 0.0  ;;  %v579_v43 = vmax.f32 %v547_v39, 0.0 }
 0x143   :  { %v295_v40 = vpop.f32.mrb[14].mxu0  ;;  %v375_v41 = vpop.f32.mrb[14].mxu1 }
 0x144   :  { %v297_v44 = vpop.f32.mrb[15].mxu0  ;;  %v377_v45 = vpop.f32.mrb[15].mxu1  ;;  %595 = vst [vmem:[%s1036_s3 + $0x30] sm:$0xff] %v563_v42  ;;  %611 = vst [vmem:[%s1036_s3 + $0xb0] sm:$0xff] %v579_v43  ;;  %v532_v46 = vadd.f32 %v903_v50, %v295_v40  ;;  %v548_v47 = vadd.f32 %v903_v50, %v375_v41 }
 0x146   :  { %v564_v51 = vmax.f32 %v532_v46, 0.0  ;;  %v580_v52 = vmax.f32 %v548_v47, 0.0 }
 0x147   :  { %v300_v48 = vpop.f32.mrb[16].mxu0  ;;  %v380_v49 = vpop.f32.mrb[16].mxu1 }
 0x148   :  { %v302_v53 = vpop.f32.mrb[17].mxu0  ;;  %v382_v54 = vpop.f32.mrb[17].mxu1  ;;  %596 = vst [vmem:[%s1036_s3 + $0x38] sm:$0xff] %v564_v51  ;;  %612 = vst [vmem:[%s1036_s3 + $0xb8] sm:$0xff] %v580_v52  ;;  %v533_v55 = vadd.f32 %v903_v50, %v300_v48  ;;  %v549_v56 = vadd.f32 %v903_v50, %v380_v49 }
 0x14a   :  { %v565_v59 = vmax.f32 %v533_v55, 0.0  ;;  %v581_v60 = vmax.f32 %v549_v56, 0.0 }
 0x14b   :  { %v305_v57 = vpop.f32.mrb[18].mxu0  ;;  %v385_v58 = vpop.f32.mrb[18].mxu1 }
 0x14c   :  { %v307_v61 = vpop.f32.mrb[19].mxu0  ;;  %v387_v62 = vpop.f32.mrb[19].mxu1  ;;  %597 = vst [vmem:[%s1036_s3 + $0x40] sm:$0xff] %v565_v59  ;;  %613 = vst [vmem:[%s1036_s3 + $0xc0] sm:$0xff] %v581_v60  ;;  %v534_v63 = vadd.f32 %v903_v50, %v305_v57  ;;  %v550_v0 = vadd.f32 %v903_v50, %v385_v58 }
 0x14e   :  { %v566_v3 = vmax.f32 %v534_v63, 0.0  ;;  %v582_v4 = vmax.f32 %v550_v0, 0.0 }
 0x14f   :  { %v310_v1 = vpop.f32.mrb[20].mxu0  ;;  %v390_v2 = vpop.f32.mrb[20].mxu1 }
 0x150   :  { %v312_v5 = vpop.f32.mrb[21].mxu0  ;;  %v392_v6 = vpop.f32.mrb[21].mxu1  ;;  %598 = vst [vmem:[%s1036_s3 + $0x48] sm:$0xff] %v566_v3  ;;  %614 = vst [vmem:[%s1036_s3 + $0xc8] sm:$0xff] %v582_v4  ;;  %v535_v7 = vadd.f32 %v903_v50, %v310_v1  ;;  %v551_v8 = vadd.f32 %v903_v50, %v390_v2 }
 0x152   :  { %v567_v11 = vmax.f32 %v535_v7, 0.0  ;;  %v583_v12 = vmax.f32 %v551_v8, 0.0 }
 0x153   :  { %v315_v9 = vpop.f32.mrb[22].mxu0  ;;  %v395_v10 = vpop.f32.mrb[22].mxu1 }
 0x154   :  { %v317_v13 = vpop.f32.mrb[23].mxu0  ;;  %v397_v14 = vpop.f32.mrb[23].mxu1  ;;  %599 = vst [vmem:[%s1036_s3 + $0x50] sm:$0xff] %v567_v11  ;;  %615 = vst [vmem:[%s1036_s3 + $0xd0] sm:$0xff] %v583_v12  ;;  %v536_v15 = vadd.f32 %v903_v50, %v315_v9  ;;  %v552_v16 = vadd.f32 %v903_v50, %v395_v10 }
 0x156   :  { %v568_v19 = vmax.f32 %v536_v15, 0.0  ;;  %v584_v20 = vmax.f32 %v552_v16, 0.0 }
 0x157   :  { %v320_v17 = vpop.f32.mrb[24].mxu0  ;;  %v400_v18 = vpop.f32.mrb[24].mxu1 }
 0x158   :  { %v322_v21 = vpop.f32.mrb[25].mxu0  ;;  %v402_v22 = vpop.f32.mrb[25].mxu1  ;;  %600 = vst [vmem:[%s1036_s3 + $0x58] sm:$0xff] %v568_v19  ;;  %616 = vst [vmem:[%s1036_s3 + $0xd8] sm:$0xff] %v584_v20  ;;  %v537_v23 = vadd.f32 %v903_v50, %v320_v17  ;;  %v553_v24 = vadd.f32 %v903_v50, %v400_v18 }
 0x15a   :  { %v569_v27 = vmax.f32 %v537_v23, 0.0  ;;  %v585_v28 = vmax.f32 %v553_v24, 0.0 }
 0x15b   :  { %v325_v25 = vpop.f32.mrb[26].mxu0  ;;  %v405_v26 = vpop.f32.mrb[26].mxu1 }
 0x15c   :  { %v327_v29 = vpop.f32.mrb[27].mxu0  ;;  %v407_v30 = vpop.f32.mrb[27].mxu1  ;;  %601 = vst [vmem:[%s1036_s3 + $0x60] sm:$0xff] %v569_v27  ;;  %617 = vst [vmem:[%s1036_s3 + $0xe0] sm:$0xff] %v585_v28  ;;  %v538_v31 = vadd.f32 %v903_v50, %v325_v25  ;;  %v554_v32 = vadd.f32 %v903_v50, %v405_v26 }
 0x15e   :  { %v570_v35 = vmax.f32 %v538_v31, 0.0  ;;  %v586_v36 = vmax.f32 %v554_v32, 0.0 }
 0x15f   :  { %v330_v33 = vpop.f32.mrb[28].mxu0  ;;  %v410_v34 = vpop.f32.mrb[28].mxu1 }
 0x160   :  { %v332_v37 = vpop.f32.mrb[29].mxu0  ;;  %v412_v38 = vpop.f32.mrb[29].mxu1  ;;  %602 = vst [vmem:[%s1036_s3 + $0x68] sm:$0xff] %v570_v35  ;;  %618 = vst [vmem:[%s1036_s3 + $0xe8] sm:$0xff] %v586_v36  ;;  %v539_v39 = vadd.f32 %v903_v50, %v330_v33  ;;  %v555_v40 = vadd.f32 %v903_v50, %v410_v34 }
 0x162   :  { %v571_v43 = vmax.f32 %v539_v39, 0.0  ;;  %v587_v44 = vmax.f32 %v555_v40, 0.0 }
 0x163   :  { %v335_v41 = vpop.f32.mrb[30].mxu0  ;;  %v415_v42 = vpop.f32.mrb[30].mxu1 }
 0x164   :  { %v337_v45 = vpop.f32.mrb[31].mxu0  ;;  %v417_v46 = vpop.f32.mrb[31].mxu1  ;;  %603 = vst [vmem:[%s1036_s3 + $0x70] sm:$0xff] %v571_v43  ;;  %619 = vst [vmem:[%s1036_s3 + $0xf0] sm:$0xff] %v587_v44  ;;  %v540_v47 = vadd.f32 %v903_v50, %v335_v41  ;;  %v556_v48 = vadd.f32 %v903_v50, %v415_v42 }
 0x166   :  { %v572_v49 = vmax.f32 %v540_v47, 0.0  ;;  %v588_v51 = vmax.f32 %v556_v48, 0.0 }
 0x168   :  { %604 = vst [vmem:[%s1036_s3 + $0x78] sm:$0xff] %v572_v49  ;;  %620 = vst [vmem:[%s1036_s3 + $0xf8] sm:$0xff] %v588_v51 }
 0x169   :  { %625 = vsyncpa [#allocation3], 1 }

// kernel: gcn_forward.7
= control target key start
LH: loop header
LB: loop body
LE: loop exit
PB: predicated region body
PF: predicated region fallthrough
CT: control target
= control target key end

     0   :  { %v1110_v0 = vmov 0.0|0.0   ;;  %s1840_s1 = inlined_call_operand.vmem [shape: f32[256,128], index: 1, kind: input, shape index: {}]   ;;  %s1841_s0 = inlined_call_operand.vmem [shape: f32[256,256], index: 0, kind: input, shape index: {}]   ;;  %s1842_s2 = inlined_call_operand.vmem [shape: f32[1,128], index: 2, kind: input, shape index: {}]   ;;  %s1843_s3 = inlined_call_operand.vmem [shape: f32[256,128], index: 3, kind: output, shape index: {}]  }
   0x1   :  { %900 = vmatprep.subr.bf16.mxu0 %v1110_v0  ;;  %948 = vmatprep.subr.bf16.mxu1 %v1110_v0  ;;  %v52_v1 = vld [vmem:[%s1840_s1] sm:$0xff]  ;;  %v53_v2 = vld [vmem:[%s1840_s1 + $0x8] sm:$0xff]  ;;  %v54_v3 = vld [vmem:[%s1840_s1 + $0x10] sm:$0xff] }
   0x2   :  { %v901_v4 = vpack.c.bf16 %v53_v2, %v52_v1  ;;  %v55_v5 = vld [vmem:[%s1840_s1 + $0x18] sm:$0xff]  ;;  %v56_v7 = vld [vmem:[%s1840_s1 + $0x20] sm:$0xff]  ;;  %v57_v8 = vld [vmem:[%s1840_s1 + $0x28] sm:$0xff] }
   0x3   :  { %v904_v6 = vpack.c.bf16 %v55_v5, %v54_v3  ;;  %v907_v9 = vpack.c.bf16 %v57_v8, %v56_v7  ;;  %v58_v10 = vld [vmem:[%s1840_s1 + $0x30] sm:$0xff]  ;;  %v59_v11 = vld [vmem:[%s1840_s1 + $0x38] sm:$0xff]  ;;  %v117_v12 = vld [vmem:[%s1841_s0 + $0x8] sm:$0xff] }
   0x4   :  { %902 = vmatpush1.bf16.msra.mxu0 %v901_v4  ;;  %964 = vmatpush1.bf16.msra.mxu1 %v901_v4  ;;  %v910_v13 = vpack.c.bf16 %v59_v11, %v58_v10  ;;  %v149_v14 = vld [vmem:[%s1841_s0 + $0x108] sm:$0xff]  ;;  %v60_v15 = vld [vmem:[%s1840_s1 + $0x40] sm:$0xff]  ;;  %v62_v18 = vld [vmem:[%s1840_s1 + $0x50] sm:$0xff] }
   0x5   :  { %903 = vmatprep.subr.bf16.mxu0 %v1110_v0  ;;  %949 = vmatprep.subr.bf16.mxu1 %v1110_v0  ;;  %v61_v16 = vld [vmem:[%s1840_s1 + $0x48] sm:$0xff]  ;;  %v63_v19 = vld [vmem:[%s1840_s1 + $0x58] sm:$0xff]  ;;  %v64_v21 = vld [vmem:[%s1840_s1 + $0x60] sm:$0xff] }
   0x6   :  { %244 = vmatprep.mubr.f32.mxu0 %v117_v12  ;;  %324 = vmatprep.mubr.f32.mxu1 %v149_v14  ;;  %v913_v17 = vpack.c.bf16 %v61_v16, %v60_v15  ;;  %v916_v20 = vpack.c.bf16 %v63_v19, %v62_v18  ;;  %v65_v22 = vld [vmem:[%s1840_s1 + $0x68] sm:$0xff]  ;;  %v66_v24 = vld [vmem:[%s1840_s1 + $0x70] sm:$0xff]  ;;  %v67_v25 = vld [vmem:[%s1840_s1 + $0x78] sm:$0xff] }
   0x7   :  { %v919_v23 = vpack.c.bf16 %v65_v22, %v64_v21  ;;  %v922_v26 = vpack.c.bf16 %v67_v25, %v66_v24  ;;  %v68_v27 = vld [vmem:[%s1840_s1 + $0x80] sm:$0xff]  ;;  %v69_v28 = vld [vmem:[%s1840_s1 + $0x88] sm:$0xff]  ;;  %v70_v30 = vld [vmem:[%s1840_s1 + $0x90] sm:$0xff] }
   0x8   :  { %905 = vmatpush1.bf16.msra.mxu0 %v904_v6  ;;  %965 = vmatpush1.bf16.msra.mxu1 %v904_v6  ;;  %v925_v29 = vpack.c.bf16 %v69_v28, %v68_v27  ;;  %v71_v31 = vld [vmem:[%s1840_s1 + $0x98] sm:$0xff]  ;;  %v72_v33 = vld [vmem:[%s1840_s1 + $0xa0] sm:$0xff]  ;;  %v73_v34 = vld [vmem:[%s1840_s1 + $0xa8] sm:$0xff] }
   0x9   :  { %906 = vmatprep.subr.bf16.mxu0 %v1110_v0  ;;  %950 = vmatprep.subr.bf16.mxu1 %v1110_v0  ;;  %v928_v32 = vpack.c.bf16 %v71_v31, %v70_v30  ;;  %v931_v35 = vpack.c.bf16 %v73_v34, %v72_v33  ;;  %v74_v36 = vld [vmem:[%s1840_s1 + $0xb0] sm:$0xff]  ;;  %v75_v37 = vld [vmem:[%s1840_s1 + $0xb8] sm:$0xff]  ;;  %v76_v39 = vld [vmem:[%s1840_s1 + $0xc0] sm:$0xff] }
   0xa   :  { %v934_v38 = vpack.c.bf16 %v75_v37, %v74_v36  ;;  %v77_v40 = vld [vmem:[%s1840_s1 + $0xc8] sm:$0xff]  ;;  %v78_v42 = vld [vmem:[%s1840_s1 + $0xd0] sm:$0xff]  ;;  %v79_v43 = vld [vmem:[%s1840_s1 + $0xd8] sm:$0xff] }
   0xb   :  { %v937_v41 = vpack.c.bf16 %v77_v40, %v76_v39  ;;  %v940_v44 = vpack.c.bf16 %v79_v43, %v78_v42  ;;  %v80_v45 = vld [vmem:[%s1840_s1 + $0xe0] sm:$0xff]  ;;  %v81_v46 = vld [vmem:[%s1840_s1 + $0xe8] sm:$0xff]  ;;  %v82_v48 = vld [vmem:[%s1840_s1 + $0xf0] sm:$0xff] }
   0xc   :  { %908 = vmatpush1.bf16.msra.mxu0 %v907_v9  ;;  %966 = vmatpush1.bf16.msra.mxu1 %v907_v9  ;;  %v943_v47 = vpack.c.bf16 %v81_v46, %v80_v45  ;;  %v83_v49 = vld [vmem:[%s1840_s1 + $0xf8] sm:$0xff]  ;;  %v116_v51 = vld [vmem:[%s1841_s0] sm:$0xff]  ;;  %v118_v55 = vld [vmem:[%s1841_s0 + $0x10] sm:$0xff] }
   0xd   :  { %909 = vmatprep.subr.bf16.mxu0 %v1110_v0  ;;  %951 = vmatprep.subr.bf16.mxu1 %v1110_v0  ;;  %v946_v50 = vpack.c.bf16 %v83_v49, %v82_v48  ;;  %v148_v52 = vld [vmem:[%s1841_s0 + $0x100] sm:$0xff]  ;;  %v119_v53 = vld [vmem:[%s1841_s0 + $0x18] sm:$0xff]  ;;  %v150_v56 = vld [vmem:[%s1841_s0 + $0x110] sm:$0xff] }
   0xe   :  { %v151_v54 = vld [vmem:[%s1841_s0 + $0x118] sm:$0xff]  ;;  %v121_v57 = vld [vmem:[%s1841_s0 + $0x28] sm:$0xff]  ;;  %v120_v59 = vld [vmem:[%s1841_s0 + $0x20] sm:$0xff] }
   0xf   :  { %v153_v58 = vld [vmem:[%s1841_s0 + $0x128] sm:$0xff]  ;;  %v152_v60 = vld [vmem:[%s1841_s0 + $0x120] sm:$0xff]  ;;  %v123_v61 = vld [vmem:[%s1841_s0 + $0x38] sm:$0xff] }
  0x10   :  { %911 = vmatpush1.bf16.msra.mxu0 %v910_v13  ;;  %967 = vmatpush1.bf16.msra.mxu1 %v910_v13  ;;  %v155_v62 = vld [vmem:[%s1841_s0 + $0x138] sm:$0xff]  ;;  %v122_v63 = vld [vmem:[%s1841_s0 + $0x30] sm:$0xff]  ;;  %v125_v1 = vld [vmem:[%s1841_s0 + $0x48] sm:$0xff] }
  0x11   :  { %912 = vmatprep.subr.bf16.mxu0 %v1110_v0  ;;  %952 = vmatprep.subr.bf16.mxu1 %v1110_v0  ;;  %v157_v2 = vld [vmem:[%s1841_s0 + $0x148] sm:$0xff]  ;;  %v124_v3 = vld [vmem:[%s1841_s0 + $0x40] sm:$0xff]  ;;  %v127_v5 = vld [vmem:[%s1841_s0 + $0x58] sm:$0xff] }
  0x12   :  { %v156_v4 = vld [vmem:[%s1841_s0 + $0x140] sm:$0xff]  ;;  %v159_v6 = vld [vmem:[%s1841_s0 + $0x158] sm:$0xff]  ;;  %v126_v7 = vld [vmem:[%s1841_s0 + $0x50] sm:$0xff] }
  0x13   :  { %v158_v8 = vld [vmem:[%s1841_s0 + $0x150] sm:$0xff]  ;;  %v129_v9 = vld [vmem:[%s1841_s0 + $0x68] sm:$0xff]  ;;  %v128_v11 = vld [vmem:[%s1841_s0 + $0x60] sm:$0xff] }
  0x14   :  { %914 = vmatpush1.bf16.msra.mxu0 %v913_v17  ;;  %968 = vmatpush1.bf16.msra.mxu1 %v913_v17  ;;  %v161_v10 = vld [vmem:[%s1841_s0 + $0x168] sm:$0xff]  ;;  %v160_v12 = vld [vmem:[%s1841_s0 + $0x160] sm:$0xff]  ;;  %v131_v13 = vld [vmem:[%s1841_s0 + $0x78] sm:$0xff] }
  0x15   :  { %915 = vmatprep.subr.bf16.mxu0 %v1110_v0  ;;  %953 = vmatprep.subr.bf16.mxu1 %v1110_v0  ;;  %v163_v14 = vld [vmem:[%s1841_s0 + $0x178] sm:$0xff]  ;;  %v130_v15 = vld [vmem:[%s1841_s0 + $0x70] sm:$0xff]  ;;  %v133_v17 = vld [vmem:[%s1841_s0 + $0x88] sm:$0xff] }
  0x16   :  { %v162_v16 = vld [vmem:[%s1841_s0 + $0x170] sm:$0xff]  ;;  %v165_v18 = vld [vmem:[%s1841_s0 + $0x188] sm:$0xff]  ;;  %v132_v19 = vld [vmem:[%s1841_s0 + $0x80] sm:$0xff] }
  0x17   :  { %v135_v21 = vld [vmem:[%s1841_s0 + $0x98] sm:$0xff]  ;;  %v166_v24 = vld [vmem:[%s1841_s0 + $0x190] sm:$0xff]  ;;  %v137_v25 = vld [vmem:[%s1841_s0 + $0xa8] sm:$0xff] }
  0x18   :  { %917 = vmatpush1.bf16.msra.mxu0 %v916_v20  ;;  %969 = vmatpush1.bf16.msra.mxu1 %v916_v20  ;;  %v164_v20 = vld [vmem:[%s1841_s0 + $0x180] sm:$0xff]  ;;  %v167_v22 = vld [vmem:[%s1841_s0 + $0x198] sm:$0xff]  ;;  %v138_v31 = vld [vmem:[%s1841_s0 + $0xb0] sm:$0xff] }
  0x19   :  { %918 = vmatprep.subr.bf16.mxu0 %v1110_v0  ;;  %954 = vmatprep.subr.bf16.mxu1 %v1110_v0  ;;  %v136_v27 = vld [vmem:[%s1841_s0 + $0xa0] sm:$0xff]  ;;  %v171_v30 = vld [vmem:[%s1841_s0 + $0x1b8] sm:$0xff]  ;;  %v141_v33 = vld [vmem:[%s1841_s0 + $0xc8] sm:$0xff] }
  0x1a   :  { %v168_v28 = vld [vmem:[%s1841_s0 + $0x1a0] sm:$0xff]  ;;  %v173_v34 = vld [vmem:[%s1841_s0 + $0x1c8] sm:$0xff]  ;;  %v143_v37 = vld [vmem:[%s1841_s0 + $0xd8] sm:$0xff] }
  0x1b   :  { %v172_v36 = vld [vmem:[%s1841_s0 + $0x1c0] sm:$0xff]  ;;  %v142_v39 = vld [vmem:[%s1841_s0 + $0xd0] sm:$0xff]  ;;  %v177_v42 = vld [vmem:[%s1841_s0 + $0x1e8] sm:$0xff] }
  0x1c   :  { %920 = vmatpush1.bf16.msra.mxu0 %v919_v23  ;;  %970 = vmatpush1.bf16.msra.mxu1 %v919_v23  ;;  %v134_v23 = vld [vmem:[%s1841_s0 + $0x90] sm:$0xff]  ;;  %v144_v43 = vld [vmem:[%s1841_s0 + $0xe0] sm:$0xff]  ;;  %v147_v45 = vld [vmem:[%s1841_s0 + $0xf8] sm:$0xff] }
  0x1d   :  { %921 = vmatprep.subr.bf16.mxu0 %v1110_v0  ;;  %955 = vmatprep.subr.bf16.mxu1 %v1110_v0  ;;  %v174_v40 = vld [vmem:[%s1841_s0 + $0x1d0] sm:$0xff]  ;;  %v179_v46 = vld [vmem:[%s1841_s0 + $0x1f8] sm:$0xff] }
  0x1e   :  { %v178_v48 = vld [vmem:[%s1841_s0 + $0x1f0] sm:$0xff] }
  0x20   :  { %923 = vmatpush1.bf16.msra.mxu0 %v922_v26  ;;  %971 = vmatpush1.bf16.msra.mxu1 %v922_v26  ;;  %v169_v26 = vld [vmem:[%s1841_s0 + $0x1a8] sm:$0xff] }
  0x21   :  { %924 = vmatprep.subr.bf16.mxu0 %v1110_v0  ;;  %956 = vmatprep.subr.bf16.mxu1 %v1110_v0 }
  0x24   :  { %926 = vmatpush1.bf16.msra.mxu0 %v925_v29  ;;  %972 = vmatpush1.bf16.msra.mxu1 %v925_v29  ;;  %v139_v29 = vld [vmem:[%s1841_s0 + $0xb8] sm:$0xff] }
  0x25   :  { %927 = vmatprep.subr.bf16.mxu0 %v1110_v0  ;;  %957 = vmatprep.subr.bf16.mxu1 %v1110_v0 }
  0x28   :  { %929 = vmatpush1.bf16.msra.mxu0 %v928_v32  ;;  %973 = vmatpush1.bf16.msra.mxu1 %v928_v32  ;;  %v170_v32 = vld [vmem:[%s1841_s0 + $0x1b0] sm:$0xff] }
  0x29   :  { %930 = vmatprep.subr.bf16.mxu0 %v1110_v0  ;;  %958 = vmatprep.subr.bf16.mxu1 %v1110_v0 }
  0x2c   :  { %932 = vmatpush1.bf16.msra.mxu0 %v931_v35  ;;  %974 = vmatpush1.bf16.msra.mxu1 %v931_v35  ;;  %v140_v35 = vld [vmem:[%s1841_s0 + $0xc0] sm:$0xff] }
  0x2d   :  { %933 = vmatprep.subr.bf16.mxu0 %v1110_v0  ;;  %959 = vmatprep.subr.bf16.mxu1 %v1110_v0 }
  0x30   :  { %935 = vmatpush1.bf16.msra.mxu0 %v934_v38  ;;  %975 = vmatpush1.bf16.msra.mxu1 %v934_v38  ;;  %v175_v38 = vld [vmem:[%s1841_s0 + $0x1d8] sm:$0xff] }
  0x31   :  { %936 = vmatprep.subr.bf16.mxu0 %v1110_v0  ;;  %960 = vmatprep.subr.bf16.mxu1 %v1110_v0 }
  0x34   :  { %938 = vmatpush1.bf16.msra.mxu0 %v937_v41  ;;  %976 = vmatpush1.bf16.msra.mxu1 %v937_v41  ;;  %v145_v41 = vld [vmem:[%s1841_s0 + $0xe8] sm:$0xff] }
  0x35   :  { %939 = vmatprep.subr.bf16.mxu0 %v1110_v0  ;;  %961 = vmatprep.subr.bf16.mxu1 %v1110_v0 }
  0x38   :  { %941 = vmatpush1.bf16.msra.mxu0 %v940_v44  ;;  %977 = vmatpush1.bf16.msra.mxu1 %v940_v44  ;;  %v176_v44 = vld [vmem:[%s1841_s0 + $0x1e0] sm:$0xff] }
  0x39   :  { %942 = vmatprep.subr.bf16.mxu0 %v1110_v0  ;;  %962 = vmatprep.subr.bf16.mxu1 %v1110_v0 }
  0x3c   :  { %944 = vmatpush1.bf16.msra.mxu0 %v943_v47  ;;  %978 = vmatpush1.bf16.msra.mxu1 %v943_v47  ;;  %v146_v47 = vld [vmem:[%s1841_s0 + $0xf0] sm:$0xff] }
  0x3d   :  { %945 = vmatprep.subr.bf16.mxu0 %v1110_v0  ;;  %963 = vmatprep.subr.bf16.mxu1 %v1110_v0  ;;  %v154_v0 = vld [vmem:[%s1841_s0 + $0x130] sm:$0xff] }
  0x40   :  { %947 = vmatpush1.bf16.msra.mxu0 %v946_v50  ;;  %979 = vmatpush1.bf16.msra.mxu1 %v946_v50 }
  0x43   :  { %245 = vmatmul.mubr.f32.vlgmr.msra.gmra.mrb[0].mxu0 %v116_v51  ;;  %325 = vmatmul.mubr.f32.vlgmr.msra.gmra.mrb[0].mxu1 %v148_v52  ;;  %v1454_v51 = vld [vmem:[%s1842_s2] ss:$0 sm:$0xff] }
  0x44   :  { %249 = vmatprep.mubr.f32.mxu0 %v119_v53  ;;  %329 = vmatprep.mubr.f32.mxu1 %v151_v54 }
  0x47   :  { %250 = vmatmul.mubr.f32.gmra.mrb[2].mxu0 %v118_v55  ;;  %330 = vmatmul.mubr.f32.gmra.mrb[2].mxu1 %v150_v56 }
  0x48   :  { %254 = vmatprep.mubr.f32.mxu0 %v121_v57  ;;  %334 = vmatprep.mubr.f32.mxu1 %v153_v58 }
  0x4b   :  { %255 = vmatmul.mubr.f32.gmra.mrb[4].mxu0 %v120_v59  ;;  %335 = vmatmul.mubr.f32.gmra.mrb[4].mxu1 %v152_v60 }
  0x4c   :  { %259 = vmatprep.mubr.f32.mxu0 %v123_v61  ;;  %339 = vmatprep.mubr.f32.mxu1 %v155_v62 }
  0x4f   :  { %260 = vmatmul.mubr.f32.gmra.mrb[6].mxu0 %v122_v63  ;;  %340 = vmatmul.mubr.f32.gmra.mrb[6].mxu1 %v154_v0 }
  0x50   :  { %264 = vmatprep.mubr.f32.mxu0 %v125_v1  ;;  %344 = vmatprep.mubr.f32.mxu1 %v157_v2 }
  0x53   :  { %265 = vmatmul.mubr.f32.gmra.mrb[8].mxu0 %v124_v3  ;;  %345 = vmatmul.mubr.f32.gmra.mrb[8].mxu1 %v156_v4 }
  0x54   :  { %269 = vmatprep.mubr.f32.mxu0 %v127_v5  ;;  %349 = vmatprep.mubr.f32.mxu1 %v159_v6 }
  0x57   :  { %270 = vmatmul.mubr.f32.gmra.mrb[10].mxu0 %v126_v7  ;;  %350 = vmatmul.mubr.f32.gmra.mrb[10].mxu1 %v158_v8 }
  0x58   :  { %274 = vmatprep.mubr.f32.mxu0 %v129_v9  ;;  %354 = vmatprep.mubr.f32.mxu1 %v161_v10 }
  0x5b   :  { %275 = vmatmul.mubr.f32.gmra.mrb[12].mxu0 %v128_v11  ;;  %355 = vmatmul.mubr.f32.gmra.mrb[12].mxu1 %v160_v12 }
  0x5c   :  { %279 = vmatprep.mubr.f32.mxu0 %v131_v13  ;;  %359 = vmatprep.mubr.f32.mxu1 %v163_v14 }
  0x5f   :  { %280 = vmatmul.mubr.f32.gmra.mrb[14].mxu0 %v130_v15  ;;  %360 = vmatmul.mubr.f32.gmra.mrb[14].mxu1 %v162_v16 }
  0x60   :  { %284 = vmatprep.mubr.f32.mxu0 %v133_v17  ;;  %364 = vmatprep.mubr.f32.mxu1 %v165_v18 }
  0x63   :  { %285 = vmatmul.mubr.f32.gmra.mrb[16].mxu0 %v132_v19  ;;  %365 = vmatmul.mubr.f32.gmra.mrb[16].mxu1 %v164_v20 }
  0x64   :  { %289 = vmatprep.mubr.f32.mxu0 %v135_v21  ;;  %369 = vmatprep.mubr.f32.mxu1 %v167_v22 }
  0x67   :  { %290 = vmatmul.mubr.f32.gmra.mrb[18].mxu0 %v134_v23  ;;  %370 = vmatmul.mubr.f32.gmra.mrb[18].mxu1 %v166_v24 }
  0x68   :  { %294 = vmatprep.mubr.f32.mxu0 %v137_v25  ;;  %374 = vmatprep.mubr.f32.mxu1 %v169_v26 }
  0x6b   :  { %295 = vmatmul.mubr.f32.gmra.mrb[20].mxu0 %v136_v27  ;;  %375 = vmatmul.mubr.f32.gmra.mrb[20].mxu1 %v168_v28 }
  0x6c   :  { %299 = vmatprep.mubr.f32.mxu0 %v139_v29  ;;  %379 = vmatprep.mubr.f32.mxu1 %v171_v30 }
  0x6f   :  { %300 = vmatmul.mubr.f32.gmra.mrb[22].mxu0 %v138_v31  ;;  %380 = vmatmul.mubr.f32.gmra.mrb[22].mxu1 %v170_v32 }
  0x70   :  { %304 = vmatprep.mubr.f32.mxu0 %v141_v33  ;;  %384 = vmatprep.mubr.f32.mxu1 %v173_v34 }
  0x73   :  { %305 = vmatmul.mubr.f32.gmra.mrb[24].mxu0 %v140_v35  ;;  %385 = vmatmul.mubr.f32.gmra.mrb[24].mxu1 %v172_v36 }
  0x74   :  { %309 = vmatprep.mubr.f32.mxu0 %v143_v37  ;;  %389 = vmatprep.mubr.f32.mxu1 %v175_v38 }
  0x77   :  { %310 = vmatmul.mubr.f32.gmra.mrb[26].mxu0 %v142_v39  ;;  %390 = vmatmul.mubr.f32.gmra.mrb[26].mxu1 %v174_v40 }
  0x78   :  { %314 = vmatprep.mubr.f32.mxu0 %v145_v41  ;;  %394 = vmatprep.mubr.f32.mxu1 %v177_v42 }
  0x7b   :  { %315 = vmatmul.mubr.f32.gmra.mrb[28].mxu0 %v144_v43  ;;  %395 = vmatmul.mubr.f32.gmra.mrb[28].mxu1 %v176_v44 }
  0x7c   :  { %319 = vmatprep.mubr.f32.mxu0 %v147_v45  ;;  %399 = vmatprep.mubr.f32.mxu1 %v179_v46 }
  0x7f   :  { %320 = vmatmul.mubr.f32.gmra.mrb[30].mxu0 %v146_v47  ;;  %400 = vmatmul.mubr.f32.gmra.mrb[30].mxu1 %v178_v48 }
 0x116   :  { %v246_v49 = vpop.f32.mrb[0].mxu0  ;;  %v326_v50 = vpop.f32.mrb[0].mxu1 }
 0x117   :  { %v248_v52 = vpop.f32.mrb[1].mxu0  ;;  %v328_v53 = vpop.f32.mrb[1].mxu1  ;;  %v1457_v54 = vadd.f32 %v1454_v51, %v246_v49  ;;  %v1461_v59 = vadd.f32 %v1454_v51, %v326_v50 }
 0x119   :  { %543 = vmax.xlane.f32.xlu0 %v1457_v54 }
 0x11a   :  { %v331_v55 = vpop.f32.mrb[2].mxu1  ;;  %v251_v56 = vpop.f32.mrb[2].mxu0 }
 0x11b   :  { %v253_v57 = vpop.f32.mrb[3].mxu0  ;;  %v333_v58 = vpop.f32.mrb[3].mxu1  ;;  %v1464_v60 = vadd.f32 %v1454_v51, %v331_v55  ;;  %v1469_v1 = vadd.f32 %v1454_v51, %v251_v56 }
 0x11d   :  { %577 = vmax.xlane.f32.xlu1 %v1464_v60  ;;  %575 = vmax.xlane.f32.xlu0 %v1461_v59 }
 0x11e   :  { %v256_v61 = vpop.f32.mrb[4].mxu0  ;;  %v336_v62 = vpop.f32.mrb[4].mxu1 }
 0x11f   :  { %v258_v63 = vpop.f32.mrb[5].mxu0  ;;  %v338_v0 = vpop.f32.mrb[5].mxu1  ;;  %v1472_v2 = vadd.f32 %v1454_v51, %v256_v61  ;;  %v1477_v7 = vadd.f32 %v1454_v51, %v336_v62 }
 0x121   :  { %545 = vmax.xlane.f32.xlu0 %v1469_v1  ;;  %547 = vmax.xlane.f32.xlu1 %v1472_v2 }
 0x122   :  { %v261_v3 = vpop.f32.mrb[6].mxu0  ;;  %v341_v4 = vpop.f32.mrb[6].mxu1 }
 0x123   :  { %v263_v5 = vpop.f32.mrb[7].mxu0  ;;  %v343_v6 = vpop.f32.mrb[7].mxu1  ;;  %v1480_v8 = vadd.f32 %v1454_v51, %v261_v3  ;;  %v1485_v13 = vadd.f32 %v1454_v51, %v341_v4 }
 0x125   :  { %579 = vmax.xlane.f32.xlu0 %v1477_v7  ;;  %549 = vmax.xlane.f32.xlu1 %v1480_v8 }
 0x126   :  { %v266_v9 = vpop.f32.mrb[8].mxu0  ;;  %v346_v10 = vpop.f32.mrb[8].mxu1 }
 0x127   :  { %v268_v11 = vpop.f32.mrb[9].mxu0  ;;  %v348_v12 = vpop.f32.mrb[9].mxu1  ;;  %v1488_v14 = vadd.f32 %v1454_v51, %v266_v9  ;;  %v1493_v19 = vadd.f32 %v1454_v51, %v346_v10 }
 0x129   :  { %581 = vmax.xlane.f32.xlu1 %v1485_v13  ;;  %551 = vmax.xlane.f32.xlu0 %v1488_v14 }
 0x12a   :  { %v271_v15 = vpop.f32.mrb[10].mxu0  ;;  %v351_v16 = vpop.f32.mrb[10].mxu1 }
 0x12b   :  { %v273_v17 = vpop.f32.mrb[11].mxu0  ;;  %v353_v18 = vpop.f32.mrb[11].mxu1  ;;  %v1496_v20 = vadd.f32 %v1454_v51, %v271_v15  ;;  %v1501_v25 = vadd.f32 %v1454_v51, %v351_v16 }
 0x12d   :  { %583 = vmax.xlane.f32.xlu0 %v1493_v19  ;;  %553 = vmax.xlane.f32.xlu1 %v1496_v20 }
 0x12e   :  { %v276_v21 = vpop.f32.mrb[12].mxu0  ;;  %v356_v22 = vpop.f32.mrb[12].mxu1 }
 0x12f   :  { %v278_v23 = vpop.f32.mrb[13].mxu0  ;;  %v358_v24 = vpop.f32.mrb[13].mxu1  ;;  %v1504_v26 = vadd.f32 %v1454_v51, %v276_v21  ;;  %v1509_v31 = vadd.f32 %v1454_v51, %v356_v22 }
 0x131   :  { %585 = vmax.xlane.f32.xlu1 %v1501_v25  ;;  %555 = vmax.xlane.f32.xlu0 %v1504_v26 }
 0x132   :  { %v281_v27 = vpop.f32.mrb[14].mxu0  ;;  %v361_v28 = vpop.f32.mrb[14].mxu1 }
 0x133   :  { %v283_v29 = vpop.f32.mrb[15].mxu0  ;;  %v363_v30 = vpop.f32.mrb[15].mxu1  ;;  %v1512_v32 = vadd.f32 %v1454_v51, %v281_v27  ;;  %v1517_v37 = vadd.f32 %v1454_v51, %v361_v28 }
 0x135   :  { %587 = vmax.xlane.f32.xlu0 %v1509_v31  ;;  %557 = vmax.xlane.f32.xlu1 %v1512_v32 }
 0x136   :  { %v286_v33 = vpop.f32.mrb[16].mxu0  ;;  %v366_v34 = vpop.f32.mrb[16].mxu1 }
 0x137   :  { %v288_v35 = vpop.f32.mrb[17].mxu0  ;;  %v368_v36 = vpop.f32.mrb[17].mxu1  ;;  %v1520_v38 = vadd.f32 %v1454_v51, %v286_v33  ;;  %v1525_v43 = vadd.f32 %v1454_v51, %v366_v34 }
 0x139   :  { %589 = vmax.xlane.f32.xlu1 %v1517_v37  ;;  %559 = vmax.xlane.f32.xlu0 %v1520_v38 }
 0x13a   :  { %v291_v39 = vpop.f32.mrb[18].mxu0  ;;  %v371_v40 = vpop.f32.mrb[18].mxu1 }
 0x13b   :  { %v293_v41 = vpop.f32.mrb[19].mxu0  ;;  %v373_v42 = vpop.f32.mrb[19].mxu1  ;;  %v1528_v44 = vadd.f32 %v1454_v51, %v291_v39  ;;  %v1533_v49 = vadd.f32 %v1454_v51, %v371_v40 }
 0x13d   :  { %591 = vmax.xlane.f32.xlu0 %v1525_v43  ;;  %561 = vmax.xlane.f32.xlu1 %v1528_v44 }
 0x13e   :  { %v296_v45 = vpop.f32.mrb[20].mxu0  ;;  %v376_v46 = vpop.f32.mrb[20].mxu1 }
 0x13f   :  { %v298_v47 = vpop.f32.mrb[21].mxu0  ;;  %v378_v48 = vpop.f32.mrb[21].mxu1  ;;  %v1536_v50 = vadd.f32 %v1454_v51, %v296_v45  ;;  %v1541_v57 = vadd.f32 %v1454_v51, %v376_v46 }
 0x141   :  { %593 = vmax.xlane.f32.xlu1 %v1533_v49  ;;  %563 = vmax.xlane.f32.xlu0 %v1536_v50 }
 0x142   :  { %v301_v52 = vpop.f32.mrb[22].mxu0  ;;  %v381_v53 = vpop.f32.mrb[22].mxu1 }
 0x143   :  { %v303_v55 = vpop.f32.mrb[23].mxu0  ;;  %v383_v56 = vpop.f32.mrb[23].mxu1  ;;  %v1544_v58 = vadd.f32 %v1454_v51, %v301_v52  ;;  %v1549_v3 = vadd.f32 %v1454_v51, %v381_v53 }
 0x145   :  { %595 = vmax.xlane.f32.xlu0 %v1541_v57  ;;  %565 = vmax.xlane.f32.xlu1 %v1544_v58 }
 0x146   :  { %v306_v61 = vpop.f32.mrb[24].mxu0  ;;  %v386_v62 = vpop.f32.mrb[24].mxu1 }
 0x147   :  { %v308_v63 = vpop.f32.mrb[25].mxu0  ;;  %v388_v0 = vpop.f32.mrb[25].mxu1  ;;  %v1552_v4 = vadd.f32 %v1454_v51, %v306_v61  ;;  %v1557_v11 = vadd.f32 %v1454_v51, %v386_v62 }
 0x149   :  { %597 = vmax.xlane.f32.xlu1 %v1549_v3  ;;  %567 = vmax.xlane.f32.xlu0 %v1552_v4 }
 0x14a   :  { %v311_v5 = vpop.f32.mrb[26].mxu0  ;;  %v391_v6 = vpop.f32.mrb[26].mxu1 }
 0x14b   :  { %v313_v9 = vpop.f32.mrb[27].mxu0  ;;  %v393_v10 = vpop.f32.mrb[27].mxu1  ;;  %v1560_v12 = vadd.f32 %v1454_v51, %v311_v5  ;;  %v1565_v21 = vadd.f32 %v1454_v51, %v391_v6 }
 0x14d   :  { %599 = vmax.xlane.f32.xlu0 %v1557_v11  ;;  %569 = vmax.xlane.f32.xlu1 %v1560_v12 }
 0x14e   :  { %v316_v15 = vpop.f32.mrb[28].mxu0  ;;  %v396_v16 = vpop.f32.mrb[28].mxu1 }
 0x14f   :  { %v318_v17 = vpop.f32.mrb[29].mxu0  ;;  %v398_v18 = vpop.f32.mrb[29].mxu1  ;;  %v1568_v22 = vadd.f32 %v1454_v51, %v316_v15  ;;  %v1573_v29 = vadd.f32 %v1454_v51, %v396_v16 }
 0x151   :  { %601 = vmax.xlane.f32.xlu1 %v1565_v21  ;;  %571 = vmax.xlane.f32.xlu0 %v1568_v22 }
 0x152   :  { %v321_v23 = vpop.f32.mrb[30].mxu0  ;;  %v401_v24 = vpop.f32.mrb[30].mxu1 }
 0x153   :  { %v323_v27 = vpop.f32.mrb[31].mxu0  ;;  %v403_v28 = vpop.f32.mrb[31].mxu1  ;;  %v1576_v30 = vadd.f32 %v1454_v51, %v321_v23  ;;  %v1579_v33 = vadd.f32 %v1454_v51, %v401_v24 }
 0x155   :  { %603 = vmax.xlane.f32.xlu0 %v1573_v29  ;;  %573 = vmax.xlane.f32.xlu1 %v1576_v30 }
 0x159   :  { %605 = vmax.xlane.f32.xlu1 %v1579_v33 }
 0x1a6   :  { %v544_v34 = vpop.xlane.xlu0 %543 }
 0x1a7   :  { %v1585_v35 = vsub.f32 %v1457_v54, %v544_v34 }
 0x1a9   :  { %v639_v36 = vmul.f32 1.442695, %v1585_v35 }
 0x1aa   :  { %v578_v39 = vpop.xlane.xlu1 %577  ;;  %v576_v40 = vpop.xlane.xlu0 %575 }
 0x1ab   :  { %982 = vpow2.f32 %v639_v36  ;;  %v1589_v41 = vsub.f32 %v1461_v59, %v576_v40  ;;  %v1593_v42 = vsub.f32 %v1464_v60, %v578_v39 }
 0x1ad   :  { %v671_v51 = vmul.f32 1.442695, %v1589_v41  ;;  %v673_v59 = vmul.f32 1.442695, %v1593_v42 }
 0x1ae   :  { %v546_v45 = vpop.xlane.xlu0 %545  ;;  %v548_v46 = vpop.xlane.xlu1 %547 }
 0x1af   :  { %v1596_v47 = vsub.f32 %v1469_v1, %v546_v45  ;;  %v1599_v54 = vsub.f32 %v1472_v2, %v548_v46  ;;  %984 = vpow2.f32 %v671_v51 }
 0x1b1   :  { %v641_v48 = vmul.f32 1.442695, %v1596_v47  ;;  %v643_v52 = vmul.f32 1.442695, %v1599_v54 }
 0x1b2   :  { %v580_v53 = vpop.xlane.xlu0 %579  ;;  %v550_v55 = vpop.xlane.xlu1 %549 }
 0x1b3   :  { %986 = vpow2.f32 %v641_v48  ;;  %v1605_v60 = vsub.f32 %v1477_v7, %v580_v53  ;;  %v1608_v56 = vsub.f32 %v1480_v8, %v550_v55 }
 0x1b4   :  { %988 = vpow2.f32 %v643_v52 }
 0x1b5   :  { %v983_v1 = vpop.eup %982  ;;  %v675_v2 = vmul.f32 1.442695, %v1605_v60  ;;  %990 = vpow2.f32 %v673_v59  ;;  %v645_v63 = vmul.f32 1.442695, %v1608_v56 }
 0x1b6   :  { %v582_v61 = vpop.xlane.xlu1 %581  ;;  %v552_v62 = vpop.xlane.xlu0 %551  ;;  %703 = vadd.xlane.f32.xlu0 %v983_v1 }
 0x1b7   :  { %992 = vpow2.f32 %v675_v2  ;;  %v1613_v0 = vsub.f32 %v1485_v13, %v582_v61  ;;  %v1616_v7 = vsub.f32 %v1488_v14, %v552_v62 }
 0x1b8   :  { %994 = vpow2.f32 %v645_v63 }
 0x1b9   :  { %v647_v8 = vmul.f32 1.442695, %v1616_v7  ;;  %v985_v5 = vpop.eup %984  ;;  %v677_v6 = vmul.f32 1.442695, %v1613_v0 }
 0x1ba   :  { %v584_v9 = vpop.xlane.xlu0 %583  ;;  %v554_v10 = vpop.xlane.xlu1 %553  ;;  %735 = vadd.xlane.f32.xlu0 %v985_v5 }
 0x1bb   :  { %v1621_v15 = vsub.f32 %v1493_v19, %v584_v9  ;;  %v1624_v16 = vsub.f32 %v1496_v20, %v554_v10  ;;  %996 = vpow2.f32 %v647_v8 }
 0x1bc   :  { %998 = vpow2.f32 %v677_v6 }
 0x1bd   :  { %v987_v13 = vpop.eup %986  ;;  %v679_v14 = vmul.f32 1.442695, %v1621_v15  ;;  %v649_v24 = vmul.f32 1.442695, %v1624_v16 }
 0x1be   :  { %v989_v17 = vpop.eup %988  ;;  %v586_v18 = vpop.xlane.xlu1 %585  ;;  %705 = vadd.xlane.f32.xlu1 %v987_v13 }
 0x1bf   :  { %v556_v23 = vpop.xlane.xlu0 %555  ;;  %1000 = vpow2.f32 %v679_v14  ;;  %v1629_v27 = vsub.f32 %v1501_v25, %v586_v18  ;;  %707 = vadd.xlane.f32.xlu0 %v989_v17  ;;  %v991_v20 = vpop.eup %990 }
 0x1c0   :  { %v1632_v19 = vsub.f32 %v1504_v26, %v556_v23  ;;  %1002 = vpow2.f32 %v649_v24 }
 0x1c1   :  { %v993_v28 = vpop.eup %992  ;;  %v681_v36 = vmul.f32 1.442695, %v1629_v27 }
 0x1c2   :  { %v651_v34 = vmul.f32 1.442695, %v1632_v19  ;;  %v558_v40 = vpop.xlane.xlu1 %557  ;;  %737 = vadd.xlane.f32.xlu1 %v991_v20  ;;  %v995_v26 = vpop.eup %994 }
 0x1c3   :  { %v588_v39 = vpop.xlane.xlu0 %587  ;;  %v1640_v25 = vsub.f32 %v1512_v32, %v558_v40  ;;  %739 = vadd.xlane.f32.xlu0 %v993_v28 }
 0x1c4   :  { %v1637_v51 = vsub.f32 %v1509_v31, %v588_v39  ;;  %1004 = vpow2.f32 %v651_v34 }
 0x1c5   :  { %v997_v46 = vpop.eup %996  ;;  %1006 = vpow2.f32 %v681_v36  ;;  %v653_v59 = vmul.f32 1.442695, %v1640_v25 }
 0x1c6   :  { %v683_v45 = vmul.f32 1.442695, %v1637_v51  ;;  %v590_v48 = vpop.xlane.xlu1 %589  ;;  %709 = vadd.xlane.f32.xlu1 %v995_v26  ;;  %v999_v32 = vpop.eup %998 }
 0x1c7   :  { %v560_v52 = vpop.xlane.xlu0 %559  ;;  %v1645_v53 = vsub.f32 %v1517_v37, %v590_v48  ;;  %711 = vadd.xlane.f32.xlu0 %v997_v46 }
 0x1c8   :  { %1008 = vpow2.f32 %v683_v45  ;;  %v1648_v31 = vsub.f32 %v1520_v38, %v560_v52 }
 0x1c9   :  { %v1001_v55 = vpop.eup %1000  ;;  %v685_v2 = vmul.f32 1.442695, %v1645_v53  ;;  %1010 = vpow2.f32 %v653_v59 }
 0x1ca   :  { %v655_v1 = vmul.f32 1.442695, %v1648_v31  ;;  %v562_v62 = vpop.xlane.xlu1 %561  ;;  %741 = vadd.xlane.f32.xlu1 %v999_v32  ;;  %v1003_v38 = vpop.eup %1002 }
 0x1cb   :  { %v592_v61 = vpop.xlane.xlu0 %591  ;;  %v1656_v37 = vsub.f32 %v1528_v44, %v562_v62  ;;  %743 = vadd.xlane.f32.xlu0 %v1001_v55 }
 0x1cc   :  { %v1653_v63 = vsub.f32 %v1525_v43, %v592_v61  ;;  %1012 = vpow2.f32 %v655_v1 }
 0x1cd   :  { %1014 = vpow2.f32 %v685_v2  ;;  %v657_v10 = vmul.f32 1.442695, %v1656_v37 }
 0x1ce   :  { %v687_v8 = vmul.f32 1.442695, %v1653_v63  ;;  %v1005_v5 = vpop.eup %1004  ;;  %v594_v6 = vpop.xlane.xlu1 %593  ;;  %713 = vadd.xlane.f32.xlu1 %v1003_v38 }
 0x1cf   :  { %v564_v9 = vpop.xlane.xlu0 %563  ;;  %v1661_v13 = vsub.f32 %v1533_v49, %v594_v6  ;;  %715 = vadd.xlane.f32.xlu0 %v1005_v5  ;;  %v1007_v44 = vpop.eup %1006 }
 0x1d0   :  { %1016 = vpow2.f32 %v687_v8  ;;  %v1664_v43 = vsub.f32 %v1536_v50, %v564_v9 }
 0x1d1   :  { %v689_v18 = vmul.f32 1.442695, %v1661_v13  ;;  %1018 = vpow2.f32 %v657_v10 }
 0x1d2   :  { %v1009_v14 = vpop.eup %1008  ;;  %v659_v17 = vmul.f32 1.442695, %v1664_v43  ;;  %v566_v24 = vpop.xlane.xlu1 %565  ;;  %745 = vadd.xlane.f32.xlu1 %v1007_v44 }
 0x1d3   :  { %v596_v23 = vpop.xlane.xlu0 %595  ;;  %v1672_v49 = vsub.f32 %v1544_v58, %v566_v24  ;;  %747 = vadd.xlane.f32.xlu0 %v1009_v14  ;;  %v1011_v50 = vpop.eup %1010 }
 0x1d4   :  { %v1669_v20 = vsub.f32 %v1541_v57, %v596_v23  ;;  %1020 = vpow2.f32 %v659_v17 }
 0x1d5   :  { %1022 = vpow2.f32 %v689_v18  ;;  %v661_v40 = vmul.f32 1.442695, %v1672_v49 }
 0x1d6   :  { %v691_v28 = vmul.f32 1.442695, %v1669_v20  ;;  %v1013_v34 = vpop.eup %1012  ;;  %v598_v36 = vpop.xlane.xlu1 %597  ;;  %717 = vadd.xlane.f32.xlu1 %v1011_v50 }
 0x1d7   :  { %v568_v39 = vpop.xlane.xlu0 %567  ;;  %v1677_v26 = vsub.f32 %v1549_v3, %v598_v36  ;;  %719 = vadd.xlane.f32.xlu0 %v1013_v34  ;;  %v1015_v58 = vpop.eup %1014 }
 0x1d8   :  { %1024 = vpow2.f32 %v691_v28  ;;  %v1680_v57 = vsub.f32 %v1552_v4, %v568_v39 }
 0x1d9   :  { %v693_v48 = vmul.f32 1.442695, %v1677_v26  ;;  %1026 = vpow2.f32 %v661_v40 }
 0x1da   :  { %v1017_v45 = vpop.eup %1016  ;;  %v663_v46 = vmul.f32 1.442695, %v1680_v57  ;;  %v570_v59 = vpop.xlane.xlu1 %569  ;;  %749 = vadd.xlane.f32.xlu1 %v1015_v58 }
 0x1db   :  { %v600_v52 = vpop.xlane.xlu0 %599  ;;  %v1688_v3 = vsub.f32 %v1560_v12, %v570_v59  ;;  %751 = vadd.xlane.f32.xlu0 %v1017_v45  ;;  %v1019_v4 = vpop.eup %1018 }
 0x1dc   :  { %v1685_v32 = vsub.f32 %v1557_v11, %v600_v52  ;;  %1028 = vpow2.f32 %v663_v46 }
 0x1dd   :  { %1030 = vpow2.f32 %v693_v48  ;;  %v665_v62 = vmul.f32 1.442695, %v1688_v3 }
 0x1de   :  { %v695_v55 = vmul.f32 1.442695, %v1685_v32  ;;  %v1021_v1 = vpop.eup %1020  ;;  %v602_v2 = vpop.xlane.xlu1 %601  ;;  %721 = vadd.xlane.f32.xlu1 %v1019_v4 }
 0x1df   :  { %v572_v61 = vpop.xlane.xlu0 %571  ;;  %v1693_v38 = vsub.f32 %v1565_v21, %v602_v2  ;;  %723 = vadd.xlane.f32.xlu0 %v1021_v1  ;;  %v1023_v12 = vpop.eup %1022 }
 0x1e0   :  { %1032 = vpow2.f32 %v695_v55  ;;  %v1696_v11 = vsub.f32 %v1568_v22, %v572_v61 }
 0x1e1   :  { %v697_v6 = vmul.f32 1.442695, %v1693_v38  ;;  %1034 = vpow2.f32 %v665_v62 }
 0x1e2   :  { %v1025_v8 = vpop.eup %1024  ;;  %v667_v5 = vmul.f32 1.442695, %v1696_v11  ;;  %753 = vadd.xlane.f32.xlu1 %v1023_v12  ;;  %v574_v10 = vpop.xlane.xlu1 %573 }
 0x1e3   :  { %v604_v9 = vpop.xlane.xlu0 %603  ;;  %755 = vadd.xlane.f32.xlu0 %v1025_v8  ;;  %v1704_v21 = vsub.f32 %v1576_v30, %v574_v10  ;;  %v1027_v22 = vpop.eup %1026 }
 0x1e4   :  { %v1701_v44 = vsub.f32 %v1573_v29, %v604_v9  ;;  %1036 = vpow2.f32 %v667_v5 }
 0x1e5   :  { %1038 = vpow2.f32 %v697_v6  ;;  %v669_v23 = vmul.f32 1.442695, %v1704_v21 }
 0x1e6   :  { %v699_v14 = vmul.f32 1.442695, %v1701_v44  ;;  %v1029_v17 = vpop.eup %1028  ;;  %725 = vadd.xlane.f32.xlu1 %v1027_v22  ;;  %v606_v18 = vpop.xlane.xlu1 %605 }
 0x1e7   :  { %727 = vadd.xlane.f32.xlu0 %v1029_v17  ;;  %v1709_v24 = vsub.f32 %v1579_v33, %v606_v18  ;;  %v1031_v29 = vpop.eup %1030 }
 0x1e8   :  { %1040 = vpow2.f32 %v699_v14 }
 0x1e9   :  { %1042 = vpow2.f32 %v669_v23  ;;  %v701_v30 = vmul.f32 1.442695, %v1709_v24 }
 0x1ea   :  { %v1033_v50 = vpop.eup %1032  ;;  %757 = vadd.xlane.f32.xlu1 %v1031_v29 }
 0x1eb   :  { %759 = vadd.xlane.f32.xlu0 %v1033_v50  ;;  %v1035_v28 = vpop.eup %1034  ;;  %1044 = vpow2.f32 %v701_v30 }
 0x1ee   :  { %v1037_v34 = vpop.eup %1036  ;;  %729 = vadd.xlane.f32.xlu1 %v1035_v28 }
 0x1ef   :  { %731 = vadd.xlane.f32.xlu0 %v1037_v34  ;;  %v1039_v36 = vpop.eup %1038 }
 0x1f2   :  { %v1041_v39 = vpop.eup %1040  ;;  %761 = vadd.xlane.f32.xlu1 %v1039_v36 }
 0x1f3   :  { %763 = vadd.xlane.f32.xlu0 %v1041_v39  ;;  %v1043_v40 = vpop.eup %1042 }
 0x1f5   :  { %v1045_v33 = vpop.eup %1044 }
 0x1f6   :  { %733 = vadd.xlane.f32.xlu1 %v1043_v40 }
 0x1fa   :  { %765 = vadd.xlane.f32.xlu1 %v1045_v33 }
 0x243   :  { %v704_v58 = vpop.xlane.xlu0 %703 }
 0x244   :  { %1046 = vlog2.f32 %v704_v58 }
 0x247   :  { %v736_v45 = vpop.xlane.xlu0 %735 }
 0x248   :  { %1048 = vlog2.f32 %v736_v45 }
 0x24b   :  { %v706_v46 = vpop.xlane.xlu1 %705 }
 0x24c   :  { %v708_v48 = vpop.xlane.xlu0 %707  ;;  %1050 = vlog2.f32 %v706_v46 }
 0x24d   :  { %1052 = vlog2.f32 %v708_v48 }
 0x24e   :  { %v1047_v52 = vpop.eup %1046 }
 0x24f   :  { %v768_v59 = vmul.f32 0.6931472, %v1047_v52  ;;  %v738_v4 = vpop.xlane.xlu1 %737 }
 0x250   :  { %v740_v55 = vpop.xlane.xlu0 %739  ;;  %1054 = vlog2.f32 %v738_v4 }
 0x251   :  { %v831_v1 = vsub.f32 %v1585_v35, %v768_v59  ;;  %1056 = vlog2.f32 %v740_v55 }
 0x252   :  { %v1049_v2 = vpop.eup %1048 }
 0x253   :  { %863 = vst [vmem:[%s1843_s3] sm:$0xff] %v831_v1  ;;  %v710_v61 = vpop.xlane.xlu1 %709  ;;  %v800_v62 = vmul.f32 0.6931472, %v1049_v2 }
 0x254   :  { %v712_v12 = vpop.xlane.xlu0 %711  ;;  %1058 = vlog2.f32 %v710_v61 }
 0x255   :  { %1060 = vlog2.f32 %v712_v12  ;;  %v847_v5 = vsub.f32 %v1589_v41, %v800_v62 }
 0x256   :  { %v1051_v8 = vpop.eup %1050 }
 0x257   :  { %v1053_v6 = vpop.eup %1052  ;;  %v770_v9 = vmul.f32 0.6931472, %v1051_v8  ;;  %v742_v10 = vpop.xlane.xlu1 %741  ;;  %879 = vst [vmem:[%s1843_s3 + $0x80] sm:$0xff] %v847_v5 }
 0x258   :  { %v772_v35 = vmul.f32 0.6931472, %v1053_v6  ;;  %v744_v22 = vpop.xlane.xlu0 %743  ;;  %1062 = vlog2.f32 %v742_v10 }
 0x259   :  { %v832_v14 = vsub.f32 %v1596_v47, %v770_v9  ;;  %1064 = vlog2.f32 %v744_v22 }
 0x25a   :  { %v1055_v17 = vpop.eup %1054  ;;  %v833_v18 = vsub.f32 %v1599_v54, %v772_v35 }
 0x25b   :  { %v1057_v23 = vpop.eup %1056  ;;  %864 = vst [vmem:[%s1843_s3 + $0x8] sm:$0xff] %v832_v14  ;;  %v802_v41 = vmul.f32 0.6931472, %v1055_v17  ;;  %v714_v29 = vpop.xlane.xlu1 %713 }
 0x25c   :  { %865 = vst [vmem:[%s1843_s3 + $0x10] sm:$0xff] %v833_v18  ;;  %v804_v50 = vmul.f32 0.6931472, %v1057_v23  ;;  %v716_v30 = vpop.xlane.xlu0 %715  ;;  %1066 = vlog2.f32 %v714_v29 }
 0x25d   :  { %v848_v47 = vsub.f32 %v1593_v42, %v802_v41  ;;  %1068 = vlog2.f32 %v716_v30 }
 0x25e   :  { %v1059_v28 = vpop.eup %1058  ;;  %v849_v54 = vsub.f32 %v1605_v60, %v804_v50 }
 0x25f   :  { %v1061_v34 = vpop.eup %1060  ;;  %880 = vst [vmem:[%s1843_s3 + $0x88] sm:$0xff] %v848_v47  ;;  %v774_v36 = vmul.f32 0.6931472, %v1059_v28  ;;  %v746_v39 = vpop.xlane.xlu1 %745 }
 0x260   :  { %881 = vst [vmem:[%s1843_s3 + $0x90] sm:$0xff] %v849_v54  ;;  %v776_v40 = vmul.f32 0.6931472, %v1061_v34  ;;  %v748_v33 = vpop.xlane.xlu0 %747  ;;  %1070 = vlog2.f32 %v746_v39 }
 0x261   :  { %v834_v42 = vsub.f32 %v1608_v56, %v774_v36  ;;  %1072 = vlog2.f32 %v748_v33 }
 0x262   :  { %v1063_v58 = vpop.eup %1062  ;;  %v835_v60 = vsub.f32 %v1616_v7, %v776_v40 }
 0x263   :  { %v1065_v45 = vpop.eup %1064  ;;  %866 = vst [vmem:[%s1843_s3 + $0x18] sm:$0xff] %v834_v42  ;;  %v806_v46 = vmul.f32 0.6931472, %v1063_v58  ;;  %v718_v48 = vpop.xlane.xlu1 %717 }
 0x264   :  { %867 = vst [vmem:[%s1843_s3 + $0x20] sm:$0xff] %v835_v60  ;;  %v808_v52 = vmul.f32 0.6931472, %v1065_v45  ;;  %v720_v59 = vpop.xlane.xlu0 %719  ;;  %1074 = vlog2.f32 %v718_v48 }
 0x265   :  { %v850_v56 = vsub.f32 %v1613_v0, %v806_v46  ;;  %1076 = vlog2.f32 %v720_v59 }
 0x266   :  { %v1067_v4 = vpop.eup %1066  ;;  %v851_v7 = vsub.f32 %v1621_v15, %v808_v52 }
 0x267   :  { %v1069_v55 = vpop.eup %1068  ;;  %882 = vst [vmem:[%s1843_s3 + $0x98] sm:$0xff] %v850_v56  ;;  %v778_v1 = vmul.f32 0.6931472, %v1067_v4  ;;  %v750_v2 = vpop.xlane.xlu1 %749 }
 0x268   :  { %883 = vst [vmem:[%s1843_s3 + $0xa0] sm:$0xff] %v851_v7  ;;  %v780_v61 = vmul.f32 0.6931472, %v1069_v55  ;;  %v752_v62 = vpop.xlane.xlu0 %751  ;;  %1078 = vlog2.f32 %v750_v2 }
 0x269   :  { %v836_v0 = vsub.f32 %v1624_v16, %v778_v1  ;;  %1080 = vlog2.f32 %v752_v62 }
 0x26a   :  { %v1071_v12 = vpop.eup %1070  ;;  %v837_v15 = vsub.f32 %v1632_v19, %v780_v61 }
 0x26b   :  { %v1073_v8 = vpop.eup %1072  ;;  %868 = vst [vmem:[%s1843_s3 + $0x28] sm:$0xff] %v836_v0  ;;  %v810_v5 = vmul.f32 0.6931472, %v1071_v12  ;;  %v722_v6 = vpop.xlane.xlu1 %721 }
 0x26c   :  { %869 = vst [vmem:[%s1843_s3 + $0x30] sm:$0xff] %v837_v15  ;;  %v812_v9 = vmul.f32 0.6931472, %v1073_v8  ;;  %v724_v10 = vpop.xlane.xlu0 %723  ;;  %1082 = vlog2.f32 %v722_v6 }
 0x26d   :  { %v852_v16 = vsub.f32 %v1629_v27, %v810_v5  ;;  %1084 = vlog2.f32 %v724_v10 }
 0x26e   :  { %v1075_v35 = vpop.eup %1074  ;;  %v853_v19 = vsub.f32 %v1637_v51, %v812_v9 }
 0x26f   :  { %v1077_v22 = vpop.eup %1076  ;;  %884 = vst [vmem:[%s1843_s3 + $0xa8] sm:$0xff] %v852_v16  ;;  %v782_v14 = vmul.f32 0.6931472, %v1075_v35  ;;  %v754_v17 = vpop.xlane.xlu1 %753 }
 0x270   :  { %885 = vst [vmem:[%s1843_s3 + $0xb0] sm:$0xff] %v853_v19  ;;  %v784_v18 = vmul.f32 0.6931472, %v1077_v22  ;;  %v756_v23 = vpop.xlane.xlu0 %755  ;;  %1086 = vlog2.f32 %v754_v17 }
 0x271   :  { %v838_v27 = vsub.f32 %v1640_v25, %v782_v14  ;;  %1088 = vlog2.f32 %v756_v23 }
 0x272   :  { %v1079_v41 = vpop.eup %1078  ;;  %v839_v51 = vsub.f32 %v1648_v31, %v784_v18 }
 0x273   :  { %v1081_v29 = vpop.eup %1080  ;;  %870 = vst [vmem:[%s1843_s3 + $0x38] sm:$0xff] %v838_v27  ;;  %v814_v50 = vmul.f32 0.6931472, %v1079_v41  ;;  %v726_v30 = vpop.xlane.xlu1 %725 }
 0x274   :  { %871 = vst [vmem:[%s1843_s3 + $0x40] sm:$0xff] %v839_v51  ;;  %v816_v47 = vmul.f32 0.6931472, %v1081_v29  ;;  %v728_v28 = vpop.xlane.xlu0 %727  ;;  %1090 = vlog2.f32 %v726_v30 }
 0x275   :  { %v854_v25 = vsub.f32 %v1645_v53, %v814_v50  ;;  %1092 = vlog2.f32 %v728_v28 }
 0x276   :  { %v1083_v54 = vpop.eup %1082  ;;  %v855_v31 = vsub.f32 %v1653_v63, %v816_v47 }
 0x277   :  { %v1085_v34 = vpop.eup %1084  ;;  %886 = vst [vmem:[%s1843_s3 + $0xb8] sm:$0xff] %v854_v25  ;;  %v786_v36 = vmul.f32 0.6931472, %v1083_v54  ;;  %v758_v39 = vpop.xlane.xlu1 %757 }
 0x278   :  { %887 = vst [vmem:[%s1843_s3 + $0xc0] sm:$0xff] %v855_v31  ;;  %v788_v40 = vmul.f32 0.6931472, %v1085_v34  ;;  %v760_v33 = vpop.xlane.xlu0 %759  ;;  %1094 = vlog2.f32 %v758_v39 }
 0x279   :  { %v840_v53 = vsub.f32 %v1656_v37, %v786_v36  ;;  %1096 = vlog2.f32 %v760_v33 }
 0x27a   :  { %v1087_v42 = vpop.eup %1086  ;;  %v841_v63 = vsub.f32 %v1664_v43, %v788_v40 }
 0x27b   :  { %v1089_v58 = vpop.eup %1088  ;;  %872 = vst [vmem:[%s1843_s3 + $0x48] sm:$0xff] %v840_v53  ;;  %v818_v60 = vmul.f32 0.6931472, %v1087_v42  ;;  %v730_v45 = vpop.xlane.xlu1 %729 }
 0x27c   :  { %873 = vst [vmem:[%s1843_s3 + $0x50] sm:$0xff] %v841_v63  ;;  %v820_v46 = vmul.f32 0.6931472, %v1089_v58  ;;  %v732_v48 = vpop.xlane.xlu0 %731  ;;  %1098 = vlog2.f32 %v730_v45 }
 0x27d   :  { %v856_v37 = vsub.f32 %v1661_v13, %v818_v60  ;;  %1100 = vlog2.f32 %v732_v48 }
 0x27e   :  { %v1091_v52 = vpop.eup %1090  ;;  %v857_v43 = vsub.f32 %v1669_v20, %v820_v46 }
 0x27f   :  { %v1093_v59 = vpop.eup %1092  ;;  %888 = vst [vmem:[%s1843_s3 + $0xc8] sm:$0xff] %v856_v37  ;;  %v790_v56 = vmul.f32 0.6931472, %v1091_v52  ;;  %v762_v4 = vpop.xlane.xlu1 %761 }
 0x280   :  { %889 = vst [vmem:[%s1843_s3 + $0xd0] sm:$0xff] %v857_v43  ;;  %v792_v7 = vmul.f32 0.6931472, %v1093_v59  ;;  %v764_v55 = vpop.xlane.xlu0 %763  ;;  %1102 = vlog2.f32 %v762_v4 }
 0x281   :  { %v842_v13 = vsub.f32 %v1672_v49, %v790_v56  ;;  %1104 = vlog2.f32 %v764_v55 }
 0x282   :  { %v1095_v1 = vpop.eup %1094  ;;  %v843_v20 = vsub.f32 %v1680_v57, %v792_v7 }
 0x283   :  { %v1097_v2 = vpop.eup %1096  ;;  %874 = vst [vmem:[%s1843_s3 + $0x58] sm:$0xff] %v842_v13  ;;  %v822_v61 = vmul.f32 0.6931472, %v1095_v1  ;;  %v734_v62 = vpop.xlane.xlu1 %733 }
 0x284   :  { %875 = vst [vmem:[%s1843_s3 + $0x60] sm:$0xff] %v843_v20  ;;  %v824_v0 = vmul.f32 0.6931472, %v1097_v2  ;;  %1106 = vlog2.f32 %v734_v62 }
 0x285   :  { %v858_v12 = vsub.f32 %v1677_v26, %v822_v61 }
 0x286   :  { %v1099_v49 = vpop.eup %1098  ;;  %v859_v15 = vsub.f32 %v1685_v32, %v824_v0 }
 0x287   :  { %v1101_v8 = vpop.eup %1100  ;;  %890 = vst [vmem:[%s1843_s3 + $0xd8] sm:$0xff] %v858_v12  ;;  %v794_v57 = vmul.f32 0.6931472, %v1099_v49  ;;  %v766_v5 = vpop.xlane.xlu1 %765 }
 0x288   :  { %891 = vst [vmem:[%s1843_s3 + $0xe0] sm:$0xff] %v859_v15  ;;  %v796_v6 = vmul.f32 0.6931472, %v1101_v8  ;;  %1108 = vlog2.f32 %v766_v5 }
 0x289   :  { %v844_v9 = vsub.f32 %v1688_v3, %v794_v57 }
 0x28a   :  { %v1103_v10 = vpop.eup %1102  ;;  %v845_v26 = vsub.f32 %v1696_v11, %v796_v6 }
 0x28b   :  { %v1105_v16 = vpop.eup %1104  ;;  %876 = vst [vmem:[%s1843_s3 + $0x68] sm:$0xff] %v844_v9  ;;  %v826_v32 = vmul.f32 0.6931472, %v1103_v10 }
 0x28c   :  { %877 = vst [vmem:[%s1843_s3 + $0x70] sm:$0xff] %v845_v26  ;;  %v828_v35 = vmul.f32 0.6931472, %v1105_v16 }
 0x28d   :  { %v860_v19 = vsub.f32 %v1693_v38, %v826_v32 }
 0x28e   :  { %v1107_v22 = vpop.eup %1106  ;;  %v861_v14 = vsub.f32 %v1701_v44, %v828_v35 }
 0x28f   :  { %892 = vst [vmem:[%s1843_s3 + $0xe8] sm:$0xff] %v860_v19  ;;  %v798_v3 = vmul.f32 0.6931472, %v1107_v22 }
 0x290   :  { %893 = vst [vmem:[%s1843_s3 + $0xf0] sm:$0xff] %v861_v14 }
 0x291   :  { %v846_v11 = vsub.f32 %v1704_v21, %v798_v3 }
 0x292   :  { %v1109_v17 = vpop.eup %1108 }
 0x293   :  { %878 = vst [vmem:[%s1843_s3 + $0x78] sm:$0xff] %v846_v11  ;;  %v830_v38 = vmul.f32 0.6931472, %v1109_v17 }
 0x295   :  { %v862_v18 = vsub.f32 %v1709_v24, %v830_v38 }
 0x297   :  { %894 = vst [vmem:[%s1843_s3 + $0xf8] sm:$0xff] %v862_v18 }

</bundles_post_ra>
